<compile_context>
chip_gen: v7x
topology: tpu7x:2x2x1
jax: 0.10.0
libtpu: 0.0.40
codegen_flags: <defaults>
</compile_context>

<pallas_src>
import functools

import jax
import jax.numpy as jnp
from jax.experimental import pallas as pl
from jax.experimental.pallas import tpu as pltpu


def _round_up(x, m):
    return ((x + m - 1) // m) * m


# --------------- Kernel 1: fused input projection + serial LSTM recurrence ---------------
def _lstm_recurrence_kernel(x_ref, w_ih_ref, w_hh_ref, b_ref, h_all_ref,
                            xproj_ref, h_scr, c_scr,
                            *, seq_len, batch_tile, hidden_p, compute_dtype):
    # x_ref     : (T*bt, E)    bf16   one batch tile, rows ordered t*bt + b_local
    # w_ih_ref  : (E, 4Hp)     bf16   resident
    # w_hh_ref  : (Hp, 4Hp)    bf16   resident
    # b_ref     : (1, 4Hp)     f32    b_ih + b_hh, gate-padded
    # h_all_ref : (T*bt, Hp)   f32    output hidden states
    # xproj_ref : (T*bt, 4Hp)  f32    scratch: x @ W_ih^T + b for every timestep
    # h_scr/c_scr: (bt, Hp)    f32    running LSTM state
    H = hidden_p
    bt = batch_tile

    # (1) Input projection for ALL timesteps at once: one big, MXU-efficient matmul,
    #     hoisted off the serial critical path.  Bias folded in here.
    xproj_ref[...] = (
        jnp.dot(x_ref[...], w_ih_ref[...], preferred_element_type=jnp.float32)
        + b_ref[...])

    # (2) Serial recurrence over time, fully inside the kernel, unrolled so the
    #     LLO scheduler sees across iterations.
    h_scr[...] = jnp.zeros_like(h_scr)   # nn.LSTM default zero initial state
    c_scr[...] = jnp.zeros_like(c_scr)

    def step(t, carry):
        row = pl.multiple_of(t * bt, bt)          # sublane-aligned dynamic offset
        h = h_scr[...]
        c = c_scr[...]
        gates = (xproj_ref[pl.ds(row, bt), :]
                 + jnp.dot(h.astype(compute_dtype), w_hh_ref[...],
                           preferred_element_type=jnp.float32))   # (bt, 4Hp)
        # Hp is a multiple of 128 -> every gate slice is lane-aligned.
        i_g = jax.nn.sigmoid(gates[:, 0 * H:1 * H])
        f_g = jax.nn.sigmoid(gates[:, 1 * H:2 * H])
        g_g = jnp.tanh(gates[:, 2 * H:3 * H])
        o_g = jax.nn.sigmoid(gates[:, 3 * H:4 * H])
        c_new = f_g * c + i_g * g_g
        h_new = o_g * jnp.tanh(c_new)
        h_scr[...] = h_new
        c_scr[...] = c_new
        h_all_ref[pl.ds(row, bt), :] = h_new
        return carry

    jax.lax.fori_loop(0, seq_len, step, 0, unroll=True)


# --------------- Kernel 2: batched output projection, tiled over vocab ---------------
def _output_proj_kernel(h_ref, w_ref, b_ref, o_ref):
    # h_ref: (M, Hp) f32 -> cast to bf16 for the MXU; w_ref: (Hp, tn) bf16; b_ref: (1, tn) f32
    h_lo = h_ref[...].astype(w_ref.dtype)
    o_ref[...] = (jnp.dot(h_lo, w_ref[...], preferred_element_type=jnp.float32)
                  + b_ref[...]).astype(o_ref.dtype)


# --------------- Full forward (embedding + both kernels), run under one jit ---------------
def _decoder_forward(embed_w, w_ih, w_hh, b_ih, b_hh, w_out, b_out,
                     features, captions):
    """features: (B, E) f32, captions: (B, T) int32 -> logits (B, T, V) f32."""
    compute_dtype = jnp.bfloat16

    B, E = features.shape
    T = captions.shape[1]            # 1 feature step + (T-1) caption embeddings
    H = w_ih.shape[0] // 4
    V = w_out.shape[0]

    # Embedding lookup + concat (fused with the kernels under jit).
    emb = jnp.take(embed_w, captions[:, :-1], axis=0)                 # (B, T-1, E)
    inputs = jnp.concatenate([features[:, None, :], emb], axis=1)     # (B, T, E)

    # ---- padded, lane/sublane-aligned layout ----
    Hp = _round_up(H, 128)                       # lane-aligned gate slices
    Vp = _round_up(V, 128)
    n_btiles = 2 if B > 8 else 1                 # >=2 tiles lets v7x's 2 TCs split the recurrence
    bt = _round_up(-(-B // n_btiles), 8)         # sublane-aligned batch tile
    Bp = n_btiles * bt

    x = jnp.transpose(inputs, (1, 0, 2))                       # (T, B, E) time-major
    x = jnp.pad(x, ((0, 0), (0, Bp - B), (0, 0)))              # (T, Bp, E)
    x = x.reshape(T, n_btiles, bt, E).transpose(1, 0, 2, 3)    # (n_btiles, T, bt, E)
    x = x.reshape(n_btiles, T * bt, E).astype(compute_dtype)   # rows = t*bt + b_local

    # Gate-padded, pre-transposed weights.  Padded hidden units get zero weights &
    # bias -> their c/h stay exactly 0 forever, so padding never changes results.
    def pad_gate_cols(w_t):      # (K, 4H) -> (K, 4Hp)
        K = w_t.shape[0]
        return jnp.pad(w_t.reshape(K, 4, H),
                       ((0, 0), (0, 0), (0, Hp - H))).reshape(K, 4 * Hp)

    w_ih_t = pad_gate_cols(w_ih.T).astype(compute_dtype)                        # (E, 4Hp)
    w_hh_t = jnp.pad(pad_gate_cols(w_hh.T),
                     ((0, Hp - H), (0, 0))).astype(compute_dtype)               # (Hp, 4Hp)
    b_gates = jnp.pad((b_ih + b_hh).reshape(4, H), ((0, 0), (0, Hp - H)))
    b_gates = b_gates.reshape(1, 4 * Hp).astype(jnp.float32)                    # (1, 4Hp)
    w_out_t = jnp.pad(w_out.T, ((0, Hp - H), (0, Vp - V))).astype(compute_dtype)  # (Hp, Vp)
    b_out2 = jnp.pad(b_out, (0, Vp - V)).reshape(1, Vp).astype(jnp.float32)       # (1, Vp)

    # ---- kernel 1: input projection + recurrence (parallel over batch tiles) ----
    rec_kernel = functools.partial(
        _lstm_recurrence_kernel, seq_len=T, batch_tile=bt, hidden_p=Hp,
        compute_dtype=compute_dtype)
    h_all = pl.pallas_call(
        rec_kernel,
        out_shape=jax.ShapeDtypeStruct((n_btiles, T * bt, Hp), jnp.float32),
        grid_spec=pltpu.PrefetchScalarGridSpec(
            num_scalar_prefetch=0,
            grid=(n_btiles,),
            in_specs=[
                pl.BlockSpec((None, T * bt, E), lambda b: (b, 0, 0)),   # x, one batch tile
                pl.BlockSpec((E, 4 * Hp), lambda b: (0, 0)),            # W_ih^T (resident)
                pl.BlockSpec((Hp, 4 * Hp), lambda b: (0, 0)),           # W_hh^T (resident)
                pl.BlockSpec((1, 4 * Hp), lambda b: (0, 0)),            # gate bias
            ],
            out_specs=pl.BlockSpec((None, T * bt, Hp), lambda b: (b, 0, 0)),
            scratch_shapes=[
                pltpu.VMEM((T * bt, 4 * Hp), jnp.float32),   # precomputed x-projection
                pltpu.VMEM((bt, Hp), jnp.float32),           # h state
                pltpu.VMEM((bt, Hp), jnp.float32),           # c state
            ],
        ),
        compiler_params=pltpu.CompilerParams(
            dimension_semantics=("parallel",),   # batch tiles are independent
        ),
    )(x, w_ih_t, w_hh_t, b_gates)

    # ---- kernel 2: batched vocab projection, V-tiled (keeps W_out VMEM bounded) ----
    M = n_btiles * T * bt
    h_flat = h_all.reshape(M, Hp)
    tn = 512 if Vp % 512 == 0 else (256 if Vp % 256 == 0 else 128)
    logits = pl.pallas_call(
        _output_proj_kernel,
        out_shape=jax.ShapeDtypeStruct((M, Vp), jnp.float32),
        grid_spec=pltpu.PrefetchScalarGridSpec(
            num_scalar_prefetch=0,
            grid=(Vp // tn,),
            in_specs=[
                pl.BlockSpec((M, Hp), lambda j: (0, 0)),     # all hidden states
                pl.BlockSpec((Hp, tn), lambda j: (0, j)),    # W_out^T vocab tile
                pl.BlockSpec((1, tn), lambda j: (0, j)),     # bias tile
            ],
            out_specs=pl.BlockSpec((M, tn), lambda j: (0, j)),
        ),
        compiler_params=pltpu.CompilerParams(
            dimension_semantics=("parallel",),
        ),
    )(h_flat, w_out_t, b_out2)

    # ---- un-pad and return batch-first (B, T, V) like the PyTorch module ----
    logits = logits.reshape(n_btiles, T, bt, Vp).transpose(0, 2, 1, 3)  # (nb, bt, T, Vp)
    logits = logits.reshape(Bp, T, Vp)[:B, :, :V]
    return logits


_jitted_forward = jax.jit(_decoder_forward)


class DecoderRNNPallas:
    """JAX/Pallas port of the PyTorch DecoderRNN forward pass (num_layers=1)."""

    def __init__(self, embed_size, hidden_size, vocab_size, key):
        self.embed_size = embed_size
        self.hidden_size = hidden_size
        self.vocab_size = vocab_size
        ks = jax.random.split(key, 7)
        s = 0.1
        self.embed_w = s * jax.random.normal(ks[0], (vocab_size, embed_size), jnp.float32)
        self.w_ih = s * jax.random.normal(ks[1], (4 * hidden_size, embed_size), jnp.float32)
        self.w_hh = s * jax.random.normal(ks[2], (4 * hidden_size, hidden_size), jnp.float32)
        self.b_ih = s * jax.random.normal(ks[3], (4 * hidden_size,), jnp.float32)
        self.b_hh = s * jax.random.normal(ks[4], (4 * hidden_size,), jnp.float32)
        self.w_out = s * jax.random.normal(ks[5], (vocab_size, hidden_size), jnp.float32)
        self.b_out = s * jax.random.normal(ks[6], (vocab_size,), jnp.float32)

    def forward(self, features, captions):
        # features: (B, E) float32 ; captions: (B, T_cap) int32
        return _jitted_forward(self.embed_w, self.w_ih, self.w_hh, self.b_ih,
                               self.b_hh, self.w_out, self.b_out, features, captions)


def _reference_forward(model, features, captions):
    """Pure-JAX f32 reference (lax.scan LSTM) for validation."""
    embeddings = model.embed_w[captions[:, :-1]]
    inputs = jnp.concatenate([features[:, None, :], embeddings], axis=1)
    x_tbe = jnp.transpose(inputs, (1, 0, 2))
    H = model.hidden_size
    B = features.shape[0]

    def step(carry, x_t):
        h, c = carry
        gates = x_t @ model.w_ih.T + h @ model.w_hh.T + model.b_ih + model.b_hh
        i = jax.nn.sigmoid(gates[:, :H])
        f = jax.nn.sigmoid(gates[:, H:2 * H])
        g = jnp.tanh(gates[:, 2 * H:3 * H])
        o = jax.nn.sigmoid(gates[:, 3 * H:4 * H])
        c_new = f * c + i * g
        h_new = o * jnp.tanh(c_new)
        return (h_new, c_new), h_new

    init = (jnp.zeros((B, H), jnp.float32), jnp.zeros((B, H), jnp.float32))
    _, hs = jax.lax.scan(step, init, x_tbe)          # (T, B, H)
    logits = hs @ model.w_out.T + model.b_out        # (T, B, V)
    return jnp.transpose(logits, (1, 0, 2))


if __name__ == "__main__":
    key = jax.random.PRNGKey(0)
    k_model, k_feat, k_cap = jax.random.split(key, 3)

    B, T_cap = 4, 8            # batch, caption length (LSTM sequence length = T_cap)
    E, H, V = 32, 64, 128      # embed_size, hidden_size, vocab_size

    model = DecoderRNNPallas(E, H, V, k_model)
    features = jax.random.normal(k_feat, (B, E), jnp.float32)
    captions = jax.random.randint(k_cap, (B, T_cap), 0, V, dtype=jnp.int32)

    out = model.forward(features, captions)
    out = jax.block_until_ready(out)

    assert out.shape == (B, T_cap, V), out.shape

    # bf16 matmul operands (f32 accumulation) -> compare to the f32 reference with a
    # correspondingly loosened tolerance (review anticipated ~1e-2 relative).
    ref = jax.block_until_ready(_reference_forward(model, features, captions))
    max_err = float(jnp.max(jnp.abs(out - ref)))
    assert jnp.allclose(out, ref, atol=3e-2, rtol=3e-2), max_err

    print("KERNEL_OK")
</pallas_src>

<mosaic_0001>
module attributes {stable_mosaic.version = 11 : i64} {
  func.func @_lstm_recurrence_kernel(%arg0: i32, %arg1: memref<1x64x32xbf16, #tpu.memory_space<vmem>>, %arg2: memref<32x512xbf16, #tpu.memory_space<vmem>>, %arg3: memref<128x512xbf16, #tpu.memory_space<vmem>>, %arg4: memref<1x512xf32, #tpu.memory_space<vmem>>, %arg5: memref<1x64x128xf32, #tpu.memory_space<vmem>>, %arg6: memref<64x512xf32, #tpu.memory_space<vmem>>, %arg7: memref<8x128xf32, #tpu.memory_space<vmem>>, %arg8: memref<8x128xf32, #tpu.memory_space<vmem>>) attributes {dimension_semantics = [#tpu.dimension_semantics<parallel>], iteration_bounds = array<i64: 1>, scalar_prefetch = 0 : i64, scratch_operands = 3 : i64, tpu.core_type = #tpu.core_type<tc>, window_params = [{transform_indices = @transform_0, window_bounds = array<i64: 1, 64, 32>}, {pipeline_mode = #tpu.pipeline_mode<synchronous>, transform_indices = @transform_1, window_bounds = array<i64: 32, 512>}, {pipeline_mode = #tpu.pipeline_mode<synchronous>, transform_indices = @transform_2, window_bounds = array<i64: 128, 512>}, {pipeline_mode = #tpu.pipeline_mode<synchronous>, transform_indices = @transform_3, window_bounds = array<i64: 1, 512>}, {transform_indices = @transform_4, window_bounds = array<i64: 1, 64, 128>}]} {
    %c0 = arith.constant 0 : index
    %c0_0 = arith.constant 0 : index
    %c0_1 = arith.constant 0 : index
    %0 = vector.load %arg1[%c0, %c0_0, %c0_1] : memref<1x64x32xbf16, #tpu.memory_space<vmem>>, vector<1x64x32xbf16>
    %1 = vector.shape_cast %0 : vector<1x64x32xbf16> to vector<64x32xbf16>
    %c0_2 = arith.constant 0 : index
    %c0_3 = arith.constant 0 : index
    %2 = vector.load %arg2[%c0_2, %c0_3] : memref<32x512xbf16, #tpu.memory_space<vmem>>, vector<32x512xbf16>
    %cst = arith.constant dense<0.000000e+00> : vector<64x512xf32>
    %3 = tpu.matmul %1, %2, %cst {dimension_numbers = #tpu.dot_dimension_numbers<[1], [0], [0], [1], [0, 0, 1, 1], [], []>} : vector<64x32xbf16>, vector<32x512xbf16>, vector<64x512xf32> -> vector<64x512xf32>
    %c0_4 = arith.constant 0 : index
    %c0_5 = arith.constant 0 : index
    %4 = vector.load %arg4[%c0_4, %c0_5] : memref<1x512xf32, #tpu.memory_space<vmem>>, vector<1x512xf32>
    %5 = vector.broadcast %4 : vector<1x512xf32> to vector<64x512xf32>
    %6 = arith.addf %3, %5 : vector<64x512xf32>
    %c0_6 = arith.constant 0 : index
    %c0_7 = arith.constant 0 : index
    %7 = vector.load %arg6[%c0_6, %c0_7] : memref<64x512xf32, #tpu.memory_space<vmem>>, vector<64x512xf32>
    tpu.vector_store %arg6[%c0_6, %c0_7], %6 {strides = array<i32>} : memref<64x512xf32, #tpu.memory_space<vmem>>, vector<64x512xf32>,
    %cst_8 = arith.constant 0.000000e+00 : f32
    %8 = vector.broadcast %cst_8 : f32 to vector<8x128xf32>
    %c0_9 = arith.constant 0 : index
    %c0_10 = arith.constant 0 : index
    %9 = vector.load %arg7[%c0_9, %c0_10] : memref<8x128xf32, #tpu.memory_space<vmem>>, vector<8x128xf32>
    tpu.vector_store %arg7[%c0_9, %c0_10], %8 {strides = array<i32>} : memref<8x128xf32, #tpu.memory_space<vmem>>, vector<8x128xf32>,
    %cst_11 = arith.constant 0.000000e+00 : f32
    %10 = vector.broadcast %cst_11 : f32 to vector<8x128xf32>
    %c0_12 = arith.constant 0 : index
    %c0_13 = arith.constant 0 : index
    %11 = vector.load %arg8[%c0_12, %c0_13] : memref<8x128xf32, #tpu.memory_space<vmem>>, vector<8x128xf32>
    tpu.vector_store %arg8[%c0_12, %c0_13], %10 {strides = array<i32>} : memref<8x128xf32, #tpu.memory_space<vmem>>, vector<8x128xf32>,
    %c0_i32 = arith.constant 0 : i32
    %c8_i32 = arith.constant 8 : i32
    %12 = arith.muli %c0_i32, %c8_i32 : i32
    %13 = tpu.assume_multiple %12, 8 : i32
    %c0_14 = arith.constant 0 : index
    %c0_15 = arith.constant 0 : index
    %14 = vector.load %arg7[%c0_14, %c0_15] : memref<8x128xf32, #tpu.memory_space<vmem>>, vector<8x128xf32>
    %c0_16 = arith.constant 0 : index
    %c0_17 = arith.constant 0 : index
    %15 = vector.load %arg8[%c0_16, %c0_17] : memref<8x128xf32, #tpu.memory_space<vmem>>, vector<8x128xf32>
    %16 = arith.index_cast %13 : i32 to index
    %c0_18 = arith.constant 0 : index
    %17 = vector.load %arg6[%16, %c0_18] : memref<64x512xf32, #tpu.memory_space<vmem>>, vector<8x512xf32>
    %18 = arith.truncf %14 : vector<8x128xf32> to vector<8x128xbf16>
    %c0_19 = arith.constant 0 : index
    %c0_20 = arith.constant 0 : index
    %19 = vector.load %arg3[%c0_19, %c0_20] : memref<128x512xbf16, #tpu.memory_space<vmem>>, vector<128x512xbf16>
    %cst_21 = arith.constant dense<0.000000e+00> : vector<8x512xf32>
    %20 = tpu.matmul %18, %19, %cst_21 {dimension_numbers = #tpu.dot_dimension_numbers<[1], [0], [0], [1], [0, 0, 1, 1], [], []>} : vector<8x128xbf16>, vector<128x512xbf16>, vector<8x512xf32> -> vector<8x512xf32>
    %21 = arith.addf %17, %20 : vector<8x512xf32>
    %22 = vector.extract_strided_slice %21 {offsets = [0, 0], sizes = [8, 128], strides = [1, 1]} : vector<8x512xf32> to vector<8x128xf32>
    %23 = arith.negf %22 : vector<8x128xf32>
    %24 = math.exp %23 : vector<8x128xf32>
    %cst_22 = arith.constant 1.000000e+00 : f32
    %25 = vector.broadcast %cst_22 : f32 to vector<8x128xf32>
    %26 = arith.addf %25, %24 : vector<8x128xf32>
    %27 = arith.divf %25, %26 : vector<8x128xf32>
    %28 = vector.extract_strided_slice %21 {offsets = [0, 128], sizes = [8, 128], strides = [1, 1]} : vector<8x512xf32> to vector<8x128xf32>
    %29 = arith.negf %28 : vector<8x128xf32>
    %30 = math.exp %29 : vector<8x128xf32>
    %cst_23 = arith.constant 1.000000e+00 : f32
    %31 = vector.broadcast %cst_23 : f32 to vector<8x128xf32>
    %32 = arith.addf %31, %30 : vector<8x128xf32>
    %33 = arith.divf %31, %32 : vector<8x128xf32>
    %34 = vector.extract_strided_slice %21 {offsets = [0, 256], sizes = [8, 128], strides = [1, 1]} : vector<8x512xf32> to vector<8x128xf32>
    %35 = math.tanh %34 : vector<8x128xf32>
    %36 = vector.extract_strided_slice %21 {offsets = [0, 384], sizes = [8, 128], strides = [1, 1]} : vector<8x512xf32> to vector<8x128xf32>
    %37 = arith.negf %36 : vector<8x128xf32>
    %38 = math.exp %37 : vector<8x128xf32>
    %cst_24 = arith.constant 1.000000e+00 : f32
    %39 = vector.broadcast %cst_24 : f32 to vector<8x128xf32>
    %40 = arith.addf %39, %38 : vector<8x128xf32>
    %41 = arith.divf %39, %40 : vector<8x128xf32>
    %42 = arith.mulf %33, %15 : vector<8x128xf32>
    %43 = arith.mulf %27, %35 : vector<8x128xf32>
    %44 = arith.addf %42, %43 : vector<8x128xf32>
    %45 = math.tanh %44 : vector<8x128xf32>
    %46 = arith.mulf %41, %45 : vector<8x128xf32>
    %c0_25 = arith.constant 0 : index
    %c0_26 = arith.constant 0 : index
    %47 = vector.load %arg7[%c0_25, %c0_26] : memref<8x128xf32, #tpu.memory_space<vmem>>, vector<8x128xf32>
    tpu.vector_store %arg7[%c0_25, %c0_26], %46 {strides = array<i32>} : memref<8x128xf32, #tpu.memory_space<vmem>>, vector<8x128xf32>,
    %c0_27 = arith.constant 0 : index
    %c0_28 = arith.constant 0 : index
    %48 = vector.load %arg8[%c0_27, %c0_28] : memref<8x128xf32, #tpu.memory_space<vmem>>, vector<8x128xf32>
    tpu.vector_store %arg8[%c0_27, %c0_28], %44 {strides = array<i32>} : memref<8x128xf32, #tpu.memory_space<vmem>>, vector<8x128xf32>,
    %c0_29 = arith.constant 0 : index
    %49 = arith.index_cast %13 : i32 to index
    %c0_30 = arith.constant 0 : index
    %50 = vector.load %arg5[%c0_29, %49, %c0_30] : memref<1x64x128xf32, #tpu.memory_space<vmem>>, vector<1x8x128xf32>
    %51 = vector.shape_cast %50 : vector<1x8x128xf32> to vector<8x128xf32>
    %52 = vector.shape_cast %46 : vector<8x128xf32> to vector<1x8x128xf32>
    tpu.vector_store %arg5[%c0_29, %49, %c0_30], %52 {strides = array<i32>} : memref<1x64x128xf32, #tpu.memory_space<vmem>>, vector<1x8x128xf32>,
    %c1_i32 = arith.constant 1 : i32
    %c8_i32_31 = arith.constant 8 : i32
    %53 = arith.muli %c1_i32, %c8_i32_31 : i32
    %54 = tpu.assume_multiple %53, 8 : i32
    %c0_32 = arith.constant 0 : index
    %c0_33 = arith.constant 0 : index
    %55 = vector.load %arg7[%c0_32, %c0_33] : memref<8x128xf32, #tpu.memory_space<vmem>>, vector<8x128xf32>
    %c0_34 = arith.constant 0 : index
    %c0_35 = arith.constant 0 : index
    %56 = vector.load %arg8[%c0_34, %c0_35] : memref<8x128xf32, #tpu.memory_space<vmem>>, vector<8x128xf32>
    %57 = arith.index_cast %54 : i32 to index
    %c0_36 = arith.constant 0 : index
    %58 = vector.load %arg6[%57, %c0_36] : memref<64x512xf32, #tpu.memory_space<vmem>>, vector<8x512xf32>
    %59 = arith.truncf %55 : vector<8x128xf32> to vector<8x128xbf16>
    %c0_37 = arith.constant 0 : index
    %c0_38 = arith.constant 0 : index
    %60 = vector.load %arg3[%c0_37, %c0_38] : memref<128x512xbf16, #tpu.memory_space<vmem>>, vector<128x512xbf16>
    %cst_39 = arith.constant dense<0.000000e+00> : vector<8x512xf32>
    %61 = tpu.matmul %59, %60, %cst_39 {dimension_numbers = #tpu.dot_dimension_numbers<[1], [0], [0], [1], [0, 0, 1, 1], [], []>} : vector<8x128xbf16>, vector<128x512xbf16>, vector<8x512xf32> -> vector<8x512xf32>
    %62 = arith.addf %58, %61 : vector<8x512xf32>
    %63 = vector.extract_strided_slice %62 {offsets = [0, 0], sizes = [8, 128], strides = [1, 1]} : vector<8x512xf32> to vector<8x128xf32>
    %64 = arith.negf %63 : vector<8x128xf32>
    %65 = math.exp %64 : vector<8x128xf32>
    %cst_40 = arith.constant 1.000000e+00 : f32
    %66 = vector.broadcast %cst_40 : f32 to vector<8x128xf32>
    %67 = arith.addf %66, %65 : vector<8x128xf32>
    %68 = arith.divf %66, %67 : vector<8x128xf32>
    %69 = vector.extract_strided_slice %62 {offsets = [0, 128], sizes = [8, 128], strides = [1, 1]} : vector<8x512xf32> to vector<8x128xf32>
    %70 = arith.negf %69 : vector<8x128xf32>
    %71 = math.exp %70 : vector<8x128xf32>
    %cst_41 = arith.constant 1.000000e+00 : f32
    %72 = vector.broadcast %cst_41 : f32 to vector<8x128xf32>
    %73 = arith.addf %72, %71 : vector<8x128xf32>
    %74 = arith.divf %72, %73 : vector<8x128xf32>
    %75 = vector.extract_strided_slice %62 {offsets = [0, 256], sizes = [8, 128], strides = [1, 1]} : vector<8x512xf32> to vector<8x128xf32>
    %76 = math.tanh %75 : vector<8x128xf32>
    %77 = vector.extract_strided_slice %62 {offsets = [0, 384], sizes = [8, 128], strides = [1, 1]} : vector<8x512xf32> to vector<8x128xf32>
    %78 = arith.negf %77 : vector<8x128xf32>
    %79 = math.exp %78 : vector<8x128xf32>
    %cst_42 = arith.constant 1.000000e+00 : f32
    %80 = vector.broadcast %cst_42 : f32 to vector<8x128xf32>
    %81 = arith.addf %80, %79 : vector<8x128xf32>
    %82 = arith.divf %80, %81 : vector<8x128xf32>
    %83 = arith.mulf %74, %56 : vector<8x128xf32>
    %84 = arith.mulf %68, %76 : vector<8x128xf32>
    %85 = arith.addf %83, %84 : vector<8x128xf32>
    %86 = math.tanh %85 : vector<8x128xf32>
    %87 = arith.mulf %82, %86 : vector<8x128xf32>
    %c0_43 = arith.constant 0 : index
    %c0_44 = arith.constant 0 : index
    %88 = vector.load %arg7[%c0_43, %c0_44] : memref<8x128xf32, #tpu.memory_space<vmem>>, vector<8x128xf32>
    tpu.vector_store %arg7[%c0_43, %c0_44], %87 {strides = array<i32>} : memref<8x128xf32, #tpu.memory_space<vmem>>, vector<8x128xf32>,
    %c0_45 = arith.constant 0 : index
    %c0_46 = arith.constant 0 : index
    %89 = vector.load %arg8[%c0_45, %c0_46] : memref<8x128xf32, #tpu.memory_space<vmem>>, vector<8x128xf32>
    tpu.vector_store %arg8[%c0_45, %c0_46], %85 {strides = array<i32>} : memref<8x128xf32, #tpu.memory_space<vmem>>, vector<8x128xf32>,
    %c0_47 = arith.constant 0 : index
    %90 = arith.index_cast %54 : i32 to index
    %c0_48 = arith.constant 0 : index
    %91 = vector.load %arg5[%c0_47, %90, %c0_48] : memref<1x64x128xf32, #tpu.memory_space<vmem>>, vector<1x8x128xf32>
    %92 = vector.shape_cast %91 : vector<1x8x128xf32> to vector<8x128xf32>
    %93 = vector.shape_cast %87 : vector<8x128xf32> to vector<1x8x128xf32>
    tpu.vector_store %arg5[%c0_47, %90, %c0_48], %93 {strides = array<i32>} : memref<1x64x128xf32, #tpu.memory_space<vmem>>, vector<1x8x128xf32>,
    %c2_i32 = arith.constant 2 : i32
    %c8_i32_49 = arith.constant 8 : i32
    %94 = arith.muli %c2_i32, %c8_i32_49 : i32
    %95 = tpu.assume_multiple %94, 8 : i32
    %c0_50 = arith.constant 0 : index
    %c0_51 = arith.constant 0 : index
    %96 = vector.load %arg7[%c0_50, %c0_51] : memref<8x128xf32, #tpu.memory_space<vmem>>, vector<8x128xf32>
    %c0_52 = arith.constant 0 : index
    %c0_53 = arith.constant 0 : index
    %97 = vector.load %arg8[%c0_52, %c0_53] : memref<8x128xf32, #tpu.memory_space<vmem>>, vector<8x128xf32>
    %98 = arith.index_cast %95 : i32 to index
    %c0_54 = arith.constant 0 : index
    %99 = vector.load %arg6[%98, %c0_54] : memref<64x512xf32, #tpu.memory_space<vmem>>, vector<8x512xf32>
    %100 = arith.truncf %96 : vector<8x128xf32> to vector<8x128xbf16>
    %c0_55 = arith.constant 0 : index
    %c0_56 = arith.constant 0 : index
    %101 = vector.load %arg3[%c0_55, %c0_56] : memref<128x512xbf16, #tpu.memory_space<vmem>>, vector<128x512xbf16>
    %cst_57 = arith.constant dense<0.000000e+00> : vector<8x512xf32>
    %102 = tpu.matmul %100, %101, %cst_57 {dimension_numbers = #tpu.dot_dimension_numbers<[1], [0], [0], [1], [0, 0, 1, 1], [], []>} : vector<8x128xbf16>, vector<128x512xbf16>, vector<8x512xf32> -> vector<8x512xf32>
    %103 = arith.addf %99, %102 : vector<8x512xf32>
    %104 = vector.extract_strided_slice %103 {offsets = [0, 0], sizes = [8, 128], strides = [1, 1]} : vector<8x512xf32> to vector<8x128xf32>
    %105 = arith.negf %104 : vector<8x128xf32>
    %106 = math.exp %105 : vector<8x128xf32>
    %cst_58 = arith.constant 1.000000e+00 : f32
    %107 = vector.broadcast %cst_58 : f32 to vector<8x128xf32>
    %108 = arith.addf %107, %106 : vector<8x128xf32>
    %109 = arith.divf %107, %108 : vector<8x128xf32>
    %110 = vector.extract_strided_slice %103 {offsets = [0, 128], sizes = [8, 128], strides = [1, 1]} : vector<8x512xf32> to vector<8x128xf32>
    %111 = arith.negf %110 : vector<8x128xf32>
    %112 = math.exp %111 : vector<8x128xf32>
    %cst_59 = arith.constant 1.000000e+00 : f32
    %113 = vector.broadcast %cst_59 : f32 to vector<8x128xf32>
    %114 = arith.addf %113, %112 : vector<8x128xf32>
    %115 = arith.divf %113, %114 : vector<8x128xf32>
    %116 = vector.extract_strided_slice %103 {offsets = [0, 256], sizes = [8, 128], strides = [1, 1]} : vector<8x512xf32> to vector<8x128xf32>
    %117 = math.tanh %116 : vector<8x128xf32>
    %118 = vector.extract_strided_slice %103 {offsets = [0, 384], sizes = [8, 128], strides = [1, 1]} : vector<8x512xf32> to vector<8x128xf32>
    %119 = arith.negf %118 : vector<8x128xf32>
    %120 = math.exp %119 : vector<8x128xf32>
    %cst_60 = arith.constant 1.000000e+00 : f32
    %121 = vector.broadcast %cst_60 : f32 to vector<8x128xf32>
    %122 = arith.addf %121, %120 : vector<8x128xf32>
    %123 = arith.divf %121, %122 : vector<8x128xf32>
    %124 = arith.mulf %115, %97 : vector<8x128xf32>
    %125 = arith.mulf %109, %117 : vector<8x128xf32>
    %126 = arith.addf %124, %125 : vector<8x128xf32>
    %127 = math.tanh %126 : vector<8x128xf32>
    %128 = arith.mulf %123, %127 : vector<8x128xf32>
    %c0_61 = arith.constant 0 : index
    %c0_62 = arith.constant 0 : index
    %129 = vector.load %arg7[%c0_61, %c0_62] : memref<8x128xf32, #tpu.memory_space<vmem>>, vector<8x128xf32>
    tpu.vector_store %arg7[%c0_61, %c0_62], %128 {strides = array<i32>} : memref<8x128xf32, #tpu.memory_space<vmem>>, vector<8x128xf32>,
    %c0_63 = arith.constant 0 : index
    %c0_64 = arith.constant 0 : index
    %130 = vector.load %arg8[%c0_63, %c0_64] : memref<8x128xf32, #tpu.memory_space<vmem>>, vector<8x128xf32>
    tpu.vector_store %arg8[%c0_63, %c0_64], %126 {strides = array<i32>} : memref<8x128xf32, #tpu.memory_space<vmem>>, vector<8x128xf32>,
    %c0_65 = arith.constant 0 : index
    %131 = arith.index_cast %95 : i32 to index
    %c0_66 = arith.constant 0 : index
    %132 = vector.load %arg5[%c0_65, %131, %c0_66] : memref<1x64x128xf32, #tpu.memory_space<vmem>>, vector<1x8x128xf32>
    %133 = vector.shape_cast %132 : vector<1x8x128xf32> to vector<8x128xf32>
    %134 = vector.shape_cast %128 : vector<8x128xf32> to vector<1x8x128xf32>
    tpu.vector_store %arg5[%c0_65, %131, %c0_66], %134 {strides = array<i32>} : memref<1x64x128xf32, #tpu.memory_space<vmem>>, vector<1x8x128xf32>,
    %c3_i32 = arith.constant 3 : i32
    %c8_i32_67 = arith.constant 8 : i32
    %135 = arith.muli %c3_i32, %c8_i32_67 : i32
    %136 = tpu.assume_multiple %135, 8 : i32
    %c0_68 = arith.constant 0 : index
    %c0_69 = arith.constant 0 : index
    %137 = vector.load %arg7[%c0_68, %c0_69] : memref<8x128xf32, #tpu.memory_space<vmem>>, vector<8x128xf32>
    %c0_70 = arith.constant 0 : index
    %c0_71 = arith.constant 0 : index
    %138 = vector.load %arg8[%c0_70, %c0_71] : memref<8x128xf32, #tpu.memory_space<vmem>>, vector<8x128xf32>
    %139 = arith.index_cast %136 : i32 to index
    %c0_72 = arith.constant 0 : index
    %140 = vector.load %arg6[%139, %c0_72] : memref<64x512xf32, #tpu.memory_space<vmem>>, vector<8x512xf32>
    %141 = arith.truncf %137 : vector<8x128xf32> to vector<8x128xbf16>
    %c0_73 = arith.constant 0 : index
    %c0_74 = arith.constant 0 : index
    %142 = vector.load %arg3[%c0_73, %c0_74] : memref<128x512xbf16, #tpu.memory_space<vmem>>, vector<128x512xbf16>
    %cst_75 = arith.constant dense<0.000000e+00> : vector<8x512xf32>
    %143 = tpu.matmul %141, %142, %cst_75 {dimension_numbers = #tpu.dot_dimension_numbers<[1], [0], [0], [1], [0, 0, 1, 1], [], []>} : vector<8x128xbf16>, vector<128x512xbf16>, vector<8x512xf32> -> vector<8x512xf32>
    %144 = arith.addf %140, %143 : vector<8x512xf32>
    %145 = vector.extract_strided_slice %144 {offsets = [0, 0], sizes = [8, 128], strides = [1, 1]} : vector<8x512xf32> to vector<8x128xf32>
    %146 = arith.negf %145 : vector<8x128xf32>
    %147 = math.exp %146 : vector<8x128xf32>
    %cst_76 = arith.constant 1.000000e+00 : f32
    %148 = vector.broadcast %cst_76 : f32 to vector<8x128xf32>
    %149 = arith.addf %148, %147 : vector<8x128xf32>
    %150 = arith.divf %148, %149 : vector<8x128xf32>
    %151 = vector.extract_strided_slice %144 {offsets = [0, 128], sizes = [8, 128], strides = [1, 1]} : vector<8x512xf32> to vector<8x128xf32>
    %152 = arith.negf %151 : vector<8x128xf32>
    %153 = math.exp %152 : vector<8x128xf32>
    %cst_77 = arith.constant 1.000000e+00 : f32
    %154 = vector.broadcast %cst_77 : f32 to vector<8x128xf32>
    %155 = arith.addf %154, %153 : vector<8x128xf32>
    %156 = arith.divf %154, %155 : vector<8x128xf32>
    %157 = vector.extract_strided_slice %144 {offsets = [0, 256], sizes = [8, 128], strides = [1, 1]} : vector<8x512xf32> to vector<8x128xf32>
    %158 = math.tanh %157 : vector<8x128xf32>
    %159 = vector.extract_strided_slice %144 {offsets = [0, 384], sizes = [8, 128], strides = [1, 1]} : vector<8x512xf32> to vector<8x128xf32>
    %160 = arith.negf %159 : vector<8x128xf32>
    %161 = math.exp %160 : vector<8x128xf32>
    %cst_78 = arith.constant 1.000000e+00 : f32
    %162 = vector.broadcast %cst_78 : f32 to vector<8x128xf32>
    %163 = arith.addf %162, %161 : vector<8x128xf32>
    %164 = arith.divf %162, %163 : vector<8x128xf32>
    %165 = arith.mulf %156, %138 : vector<8x128xf32>
    %166 = arith.mulf %150, %158 : vector<8x128xf32>
    %167 = arith.addf %165, %166 : vector<8x128xf32>
    %168 = math.tanh %167 : vector<8x128xf32>
    %169 = arith.mulf %164, %168 : vector<8x128xf32>
    %c0_79 = arith.constant 0 : index
    %c0_80 = arith.constant 0 : index
    %170 = vector.load %arg7[%c0_79, %c0_80] : memref<8x128xf32, #tpu.memory_space<vmem>>, vector<8x128xf32>
    tpu.vector_store %arg7[%c0_79, %c0_80], %169 {strides = array<i32>} : memref<8x128xf32, #tpu.memory_space<vmem>>, vector<8x128xf32>,
    %c0_81 = arith.constant 0 : index
    %c0_82 = arith.constant 0 : index
    %171 = vector.load %arg8[%c0_81, %c0_82] : memref<8x128xf32, #tpu.memory_space<vmem>>, vector<8x128xf32>
    tpu.vector_store %arg8[%c0_81, %c0_82], %167 {strides = array<i32>} : memref<8x128xf32, #tpu.memory_space<vmem>>, vector<8x128xf32>,
    %c0_83 = arith.constant 0 : index
    %172 = arith.index_cast %136 : i32 to index
    %c0_84 = arith.constant 0 : index
    %173 = vector.load %arg5[%c0_83, %172, %c0_84] : memref<1x64x128xf32, #tpu.memory_space<vmem>>, vector<1x8x128xf32>
    %174 = vector.shape_cast %173 : vector<1x8x128xf32> to vector<8x128xf32>
    %175 = vector.shape_cast %169 : vector<8x128xf32> to vector<1x8x128xf32>
    tpu.vector_store %arg5[%c0_83, %172, %c0_84], %175 {strides = array<i32>} : memref<1x64x128xf32, #tpu.memory_space<vmem>>, vector<1x8x128xf32>,
    %c4_i32 = arith.constant 4 : i32
    %c8_i32_85 = arith.constant 8 : i32
    %176 = arith.muli %c4_i32, %c8_i32_85 : i32
    %177 = tpu.assume_multiple %176, 8 : i32
    %c0_86 = arith.constant 0 : index
    %c0_87 = arith.constant 0 : index
    %178 = vector.load %arg7[%c0_86, %c0_87] : memref<8x128xf32, #tpu.memory_space<vmem>>, vector<8x128xf32>
    %c0_88 = arith.constant 0 : index
    %c0_89 = arith.constant 0 : index
    %179 = vector.load %arg8[%c0_88, %c0_89] : memref<8x128xf32, #tpu.memory_space<vmem>>, vector<8x128xf32>
    %180 = arith.index_cast %177 : i32 to index
    %c0_90 = arith.constant 0 : index
    %181 = vector.load %arg6[%180, %c0_90] : memref<64x512xf32, #tpu.memory_space<vmem>>, vector<8x512xf32>
    %182 = arith.truncf %178 : vector<8x128xf32> to vector<8x128xbf16>
    %c0_91 = arith.constant 0 : index
    %c0_92 = arith.constant 0 : index
    %183 = vector.load %arg3[%c0_91, %c0_92] : memref<128x512xbf16, #tpu.memory_space<vmem>>, vector<128x512xbf16>
    %cst_93 = arith.constant dense<0.000000e+00> : vector<8x512xf32>
    %184 = tpu.matmul %182, %183, %cst_93 {dimension_numbers = #tpu.dot_dimension_numbers<[1], [0], [0], [1], [0, 0, 1, 1], [], []>} : vector<8x128xbf16>, vector<128x512xbf16>, vector<8x512xf32> -> vector<8x512xf32>
    %185 = arith.addf %181, %184 : vector<8x512xf32>
    %186 = vector.extract_strided_slice %185 {offsets = [0, 0], sizes = [8, 128], strides = [1, 1]} : vector<8x512xf32> to vector<8x128xf32>
    %187 = arith.negf %186 : vector<8x128xf32>
    %188 = math.exp %187 : vector<8x128xf32>
    %cst_94 = arith.constant 1.000000e+00 : f32
    %189 = vector.broadcast %cst_94 : f32 to vector<8x128xf32>
    %190 = arith.addf %189, %188 : vector<8x128xf32>
    %191 = arith.divf %189, %190 : vector<8x128xf32>
    %192 = vector.extract_strided_slice %185 {offsets = [0, 128], sizes = [8, 128], strides = [1, 1]} : vector<8x512xf32> to vector<8x128xf32>
    %193 = arith.negf %192 : vector<8x128xf32>
    %194 = math.exp %193 : vector<8x128xf32>
    %cst_95 = arith.constant 1.000000e+00 : f32
    %195 = vector.broadcast %cst_95 : f32 to vector<8x128xf32>
    %196 = arith.addf %195, %194 : vector<8x128xf32>
    %197 = arith.divf %195, %196 : vector<8x128xf32>
    %198 = vector.extract_strided_slice %185 {offsets = [0, 256], sizes = [8, 128], strides = [1, 1]} : vector<8x512xf32> to vector<8x128xf32>
    %199 = math.tanh %198 : vector<8x128xf32>
    %200 = vector.extract_strided_slice %185 {offsets = [0, 384], sizes = [8, 128], strides = [1, 1]} : vector<8x512xf32> to vector<8x128xf32>
    %201 = arith.negf %200 : vector<8x128xf32>
    %202 = math.exp %201 : vector<8x128xf32>
    %cst_96 = arith.constant 1.000000e+00 : f32
    %203 = vector.broadcast %cst_96 : f32 to vector<8x128xf32>
    %204 = arith.addf %203, %202 : vector<8x128xf32>
    %205 = arith.divf %203, %204 : vector<8x128xf32>
    %206 = arith.mulf %197, %179 : vector<8x128xf32>
    %207 = arith.mulf %191, %199 : vector<8x128xf32>
    %208 = arith.addf %206, %207 : vector<8x128xf32>
    %209 = math.tanh %208 : vector<8x128xf32>
    %210 = arith.mulf %205, %209 : vector<8x128xf32>
    %c0_97 = arith.constant 0 : index
    %c0_98 = arith.constant 0 : index
    %211 = vector.load %arg7[%c0_97, %c0_98] : memref<8x128xf32, #tpu.memory_space<vmem>>, vector<8x128xf32>
    tpu.vector_store %arg7[%c0_97, %c0_98], %210 {strides = array<i32>} : memref<8x128xf32, #tpu.memory_space<vmem>>, vector<8x128xf32>,
    %c0_99 = arith.constant 0 : index
    %c0_100 = arith.constant 0 : index
    %212 = vector.load %arg8[%c0_99, %c0_100] : memref<8x128xf32, #tpu.memory_space<vmem>>, vector<8x128xf32>
    tpu.vector_store %arg8[%c0_99, %c0_100], %208 {strides = array<i32>} : memref<8x128xf32, #tpu.memory_space<vmem>>, vector<8x128xf32>,
    %c0_101 = arith.constant 0 : index
    %213 = arith.index_cast %177 : i32 to index
    %c0_102 = arith.constant 0 : index
    %214 = vector.load %arg5[%c0_101, %213, %c0_102] : memref<1x64x128xf32, #tpu.memory_space<vmem>>, vector<1x8x128xf32>
    %215 = vector.shape_cast %214 : vector<1x8x128xf32> to vector<8x128xf32>
    %216 = vector.shape_cast %210 : vector<8x128xf32> to vector<1x8x128xf32>
    tpu.vector_store %arg5[%c0_101, %213, %c0_102], %216 {strides = array<i32>} : memref<1x64x128xf32, #tpu.memory_space<vmem>>, vector<1x8x128xf32>,
    %c5_i32 = arith.constant 5 : i32
    %c8_i32_103 = arith.constant 8 : i32
    %217 = arith.muli %c5_i32, %c8_i32_103 : i32
    %218 = tpu.assume_multiple %217, 8 : i32
    %c0_104 = arith.constant 0 : index
    %c0_105 = arith.constant 0 : index
    %219 = vector.load %arg7[%c0_104, %c0_105] : memref<8x128xf32, #tpu.memory_space<vmem>>, vector<8x128xf32>
    %c0_106 = arith.constant 0 : index
    %c0_107 = arith.constant 0 : index
    %220 = vector.load %arg8[%c0_106, %c0_107] : memref<8x128xf32, #tpu.memory_space<vmem>>, vector<8x128xf32>
    %221 = arith.index_cast %218 : i32 to index
    %c0_108 = arith.constant 0 : index
    %222 = vector.load %arg6[%221, %c0_108] : memref<64x512xf32, #tpu.memory_space<vmem>>, vector<8x512xf32>
    %223 = arith.truncf %219 : vector<8x128xf32> to vector<8x128xbf16>
    %c0_109 = arith.constant 0 : index
    %c0_110 = arith.constant 0 : index
    %224 = vector.load %arg3[%c0_109, %c0_110] : memref<128x512xbf16, #tpu.memory_space<vmem>>, vector<128x512xbf16>
    %cst_111 = arith.constant dense<0.000000e+00> : vector<8x512xf32>
    %225 = tpu.matmul %223, %224, %cst_111 {dimension_numbers = #tpu.dot_dimension_numbers<[1], [0], [0], [1], [0, 0, 1, 1], [], []>} : vector<8x128xbf16>, vector<128x512xbf16>, vector<8x512xf32> -> vector<8x512xf32>
    %226 = arith.addf %222, %225 : vector<8x512xf32>
    %227 = vector.extract_strided_slice %226 {offsets = [0, 0], sizes = [8, 128], strides = [1, 1]} : vector<8x512xf32> to vector<8x128xf32>
    %228 = arith.negf %227 : vector<8x128xf32>
    %229 = math.exp %228 : vector<8x128xf32>
    %cst_112 = arith.constant 1.000000e+00 : f32
    %230 = vector.broadcast %cst_112 : f32 to vector<8x128xf32>
    %231 = arith.addf %230, %229 : vector<8x128xf32>
    %232 = arith.divf %230, %231 : vector<8x128xf32>
    %233 = vector.extract_strided_slice %226 {offsets = [0, 128], sizes = [8, 128], strides = [1, 1]} : vector<8x512xf32> to vector<8x128xf32>
    %234 = arith.negf %233 : vector<8x128xf32>
    %235 = math.exp %234 : vector<8x128xf32>
    %cst_113 = arith.constant 1.000000e+00 : f32
    %236 = vector.broadcast %cst_113 : f32 to vector<8x128xf32>
    %237 = arith.addf %236, %235 : vector<8x128xf32>
    %238 = arith.divf %236, %237 : vector<8x128xf32>
    %239 = vector.extract_strided_slice %226 {offsets = [0, 256], sizes = [8, 128], strides = [1, 1]} : vector<8x512xf32> to vector<8x128xf32>
    %240 = math.tanh %239 : vector<8x128xf32>
    %241 = vector.extract_strided_slice %226 {offsets = [0, 384], sizes = [8, 128], strides = [1, 1]} : vector<8x512xf32> to vector<8x128xf32>
    %242 = arith.negf %241 : vector<8x128xf32>
    %243 = math.exp %242 : vector<8x128xf32>
    %cst_114 = arith.constant 1.000000e+00 : f32
    %244 = vector.broadcast %cst_114 : f32 to vector<8x128xf32>
    %245 = arith.addf %244, %243 : vector<8x128xf32>
    %246 = arith.divf %244, %245 : vector<8x128xf32>
    %247 = arith.mulf %238, %220 : vector<8x128xf32>
    %248 = arith.mulf %232, %240 : vector<8x128xf32>
    %249 = arith.addf %247, %248 : vector<8x128xf32>
    %250 = math.tanh %249 : vector<8x128xf32>
    %251 = arith.mulf %246, %250 : vector<8x128xf32>
    %c0_115 = arith.constant 0 : index
    %c0_116 = arith.constant 0 : index
    %252 = vector.load %arg7[%c0_115, %c0_116] : memref<8x128xf32, #tpu.memory_space<vmem>>, vector<8x128xf32>
    tpu.vector_store %arg7[%c0_115, %c0_116], %251 {strides = array<i32>} : memref<8x128xf32, #tpu.memory_space<vmem>>, vector<8x128xf32>,
    %c0_117 = arith.constant 0 : index
    %c0_118 = arith.constant 0 : index
    %253 = vector.load %arg8[%c0_117, %c0_118] : memref<8x128xf32, #tpu.memory_space<vmem>>, vector<8x128xf32>
    tpu.vector_store %arg8[%c0_117, %c0_118], %249 {strides = array<i32>} : memref<8x128xf32, #tpu.memory_space<vmem>>, vector<8x128xf32>,
    %c0_119 = arith.constant 0 : index
    %254 = arith.index_cast %218 : i32 to index
    %c0_120 = arith.constant 0 : index
    %255 = vector.load %arg5[%c0_119, %254, %c0_120] : memref<1x64x128xf32, #tpu.memory_space<vmem>>, vector<1x8x128xf32>
    %256 = vector.shape_cast %255 : vector<1x8x128xf32> to vector<8x128xf32>
    %257 = vector.shape_cast %251 : vector<8x128xf32> to vector<1x8x128xf32>
    tpu.vector_store %arg5[%c0_119, %254, %c0_120], %257 {strides = array<i32>} : memref<1x64x128xf32, #tpu.memory_space<vmem>>, vector<1x8x128xf32>,
    %c6_i32 = arith.constant 6 : i32
    %c8_i32_121 = arith.constant 8 : i32
    %258 = arith.muli %c6_i32, %c8_i32_121 : i32
    %259 = tpu.assume_multiple %258, 8 : i32
    %c0_122 = arith.constant 0 : index
    %c0_123 = arith.constant 0 : index
    %260 = vector.load %arg7[%c0_122, %c0_123] : memref<8x128xf32, #tpu.memory_space<vmem>>, vector<8x128xf32>
    %c0_124 = arith.constant 0 : index
    %c0_125 = arith.constant 0 : index
    %261 = vector.load %arg8[%c0_124, %c0_125] : memref<8x128xf32, #tpu.memory_space<vmem>>, vector<8x128xf32>
    %262 = arith.index_cast %259 : i32 to index
    %c0_126 = arith.constant 0 : index
    %263 = vector.load %arg6[%262, %c0_126] : memref<64x512xf32, #tpu.memory_space<vmem>>, vector<8x512xf32>
    %264 = arith.truncf %260 : vector<8x128xf32> to vector<8x128xbf16>
    %c0_127 = arith.constant 0 : index
    %c0_128 = arith.constant 0 : index
    %265 = vector.load %arg3[%c0_127, %c0_128] : memref<128x512xbf16, #tpu.memory_space<vmem>>, vector<128x512xbf16>
    %cst_129 = arith.constant dense<0.000000e+00> : vector<8x512xf32>
    %266 = tpu.matmul %264, %265, %cst_129 {dimension_numbers = #tpu.dot_dimension_numbers<[1], [0], [0], [1], [0, 0, 1, 1], [], []>} : vector<8x128xbf16>, vector<128x512xbf16>, vector<8x512xf32> -> vector<8x512xf32>
    %267 = arith.addf %263, %266 : vector<8x512xf32>
    %268 = vector.extract_strided_slice %267 {offsets = [0, 0], sizes = [8, 128], strides = [1, 1]} : vector<8x512xf32> to vector<8x128xf32>
    %269 = arith.negf %268 : vector<8x128xf32>
    %270 = math.exp %269 : vector<8x128xf32>
    %cst_130 = arith.constant 1.000000e+00 : f32
    %271 = vector.broadcast %cst_130 : f32 to vector<8x128xf32>
    %272 = arith.addf %271, %270 : vector<8x128xf32>
    %273 = arith.divf %271, %272 : vector<8x128xf32>
    %274 = vector.extract_strided_slice %267 {offsets = [0, 128], sizes = [8, 128], strides = [1, 1]} : vector<8x512xf32> to vector<8x128xf32>
    %275 = arith.negf %274 : vector<8x128xf32>
    %276 = math.exp %275 : vector<8x128xf32>
    %cst_131 = arith.constant 1.000000e+00 : f32
    %277 = vector.broadcast %cst_131 : f32 to vector<8x128xf32>
    %278 = arith.addf %277, %276 : vector<8x128xf32>
    %279 = arith.divf %277, %278 : vector<8x128xf32>
    %280 = vector.extract_strided_slice %267 {offsets = [0, 256], sizes = [8, 128], strides = [1, 1]} : vector<8x512xf32> to vector<8x128xf32>
    %281 = math.tanh %280 : vector<8x128xf32>
    %282 = vector.extract_strided_slice %267 {offsets = [0, 384], sizes = [8, 128], strides = [1, 1]} : vector<8x512xf32> to vector<8x128xf32>
    %283 = arith.negf %282 : vector<8x128xf32>
    %284 = math.exp %283 : vector<8x128xf32>
    %cst_132 = arith.constant 1.000000e+00 : f32
    %285 = vector.broadcast %cst_132 : f32 to vector<8x128xf32>
    %286 = arith.addf %285, %284 : vector<8x128xf32>
    %287 = arith.divf %285, %286 : vector<8x128xf32>
    %288 = arith.mulf %279, %261 : vector<8x128xf32>
    %289 = arith.mulf %273, %281 : vector<8x128xf32>
    %290 = arith.addf %288, %289 : vector<8x128xf32>
    %291 = math.tanh %290 : vector<8x128xf32>
    %292 = arith.mulf %287, %291 : vector<8x128xf32>
    %c0_133 = arith.constant 0 : index
    %c0_134 = arith.constant 0 : index
    %293 = vector.load %arg7[%c0_133, %c0_134] : memref<8x128xf32, #tpu.memory_space<vmem>>, vector<8x128xf32>
    tpu.vector_store %arg7[%c0_133, %c0_134], %292 {strides = array<i32>} : memref<8x128xf32, #tpu.memory_space<vmem>>, vector<8x128xf32>,
    %c0_135 = arith.constant 0 : index
    %c0_136 = arith.constant 0 : index
    %294 = vector.load %arg8[%c0_135, %c0_136] : memref<8x128xf32, #tpu.memory_space<vmem>>, vector<8x128xf32>
    tpu.vector_store %arg8[%c0_135, %c0_136], %290 {strides = array<i32>} : memref<8x128xf32, #tpu.memory_space<vmem>>, vector<8x128xf32>,
    %c0_137 = arith.constant 0 : index
    %295 = arith.index_cast %259 : i32 to index
    %c0_138 = arith.constant 0 : index
    %296 = vector.load %arg5[%c0_137, %295, %c0_138] : memref<1x64x128xf32, #tpu.memory_space<vmem>>, vector<1x8x128xf32>
    %297 = vector.shape_cast %296 : vector<1x8x128xf32> to vector<8x128xf32>
    %298 = vector.shape_cast %292 : vector<8x128xf32> to vector<1x8x128xf32>
    tpu.vector_store %arg5[%c0_137, %295, %c0_138], %298 {strides = array<i32>} : memref<1x64x128xf32, #tpu.memory_space<vmem>>, vector<1x8x128xf32>,
    %c7_i32 = arith.constant 7 : i32
    %c8_i32_139 = arith.constant 8 : i32
    %299 = arith.muli %c7_i32, %c8_i32_139 : i32
    %300 = tpu.assume_multiple %299, 8 : i32
    %c0_140 = arith.constant 0 : index
    %c0_141 = arith.constant 0 : index
    %301 = vector.load %arg7[%c0_140, %c0_141] : memref<8x128xf32, #tpu.memory_space<vmem>>, vector<8x128xf32>
    %c0_142 = arith.constant 0 : index
    %c0_143 = arith.constant 0 : index
    %302 = vector.load %arg8[%c0_142, %c0_143] : memref<8x128xf32, #tpu.memory_space<vmem>>, vector<8x128xf32>
    %303 = arith.index_cast %300 : i32 to index
    %c0_144 = arith.constant 0 : index
    %304 = vector.load %arg6[%303, %c0_144] : memref<64x512xf32, #tpu.memory_space<vmem>>, vector<8x512xf32>
    %305 = arith.truncf %301 : vector<8x128xf32> to vector<8x128xbf16>
    %c0_145 = arith.constant 0 : index
    %c0_146 = arith.constant 0 : index
    %306 = vector.load %arg3[%c0_145, %c0_146] : memref<128x512xbf16, #tpu.memory_space<vmem>>, vector<128x512xbf16>
    %cst_147 = arith.constant dense<0.000000e+00> : vector<8x512xf32>
    %307 = tpu.matmul %305, %306, %cst_147 {dimension_numbers = #tpu.dot_dimension_numbers<[1], [0], [0], [1], [0, 0, 1, 1], [], []>} : vector<8x128xbf16>, vector<128x512xbf16>, vector<8x512xf32> -> vector<8x512xf32>
    %308 = arith.addf %304, %307 : vector<8x512xf32>
    %309 = vector.extract_strided_slice %308 {offsets = [0, 0], sizes = [8, 128], strides = [1, 1]} : vector<8x512xf32> to vector<8x128xf32>
    %310 = arith.negf %309 : vector<8x128xf32>
    %311 = math.exp %310 : vector<8x128xf32>
    %cst_148 = arith.constant 1.000000e+00 : f32
    %312 = vector.broadcast %cst_148 : f32 to vector<8x128xf32>
    %313 = arith.addf %312, %311 : vector<8x128xf32>
    %314 = arith.divf %312, %313 : vector<8x128xf32>
    %315 = vector.extract_strided_slice %308 {offsets = [0, 128], sizes = [8, 128], strides = [1, 1]} : vector<8x512xf32> to vector<8x128xf32>
    %316 = arith.negf %315 : vector<8x128xf32>
    %317 = math.exp %316 : vector<8x128xf32>
    %cst_149 = arith.constant 1.000000e+00 : f32
    %318 = vector.broadcast %cst_149 : f32 to vector<8x128xf32>
    %319 = arith.addf %318, %317 : vector<8x128xf32>
    %320 = arith.divf %318, %319 : vector<8x128xf32>
    %321 = vector.extract_strided_slice %308 {offsets = [0, 256], sizes = [8, 128], strides = [1, 1]} : vector<8x512xf32> to vector<8x128xf32>
    %322 = math.tanh %321 : vector<8x128xf32>
    %323 = vector.extract_strided_slice %308 {offsets = [0, 384], sizes = [8, 128], strides = [1, 1]} : vector<8x512xf32> to vector<8x128xf32>
    %324 = arith.negf %323 : vector<8x128xf32>
    %325 = math.exp %324 : vector<8x128xf32>
    %cst_150 = arith.constant 1.000000e+00 : f32
    %326 = vector.broadcast %cst_150 : f32 to vector<8x128xf32>
    %327 = arith.addf %326, %325 : vector<8x128xf32>
    %328 = arith.divf %326, %327 : vector<8x128xf32>
    %329 = arith.mulf %320, %302 : vector<8x128xf32>
    %330 = arith.mulf %314, %322 : vector<8x128xf32>
    %331 = arith.addf %329, %330 : vector<8x128xf32>
    %332 = math.tanh %331 : vector<8x128xf32>
    %333 = arith.mulf %328, %332 : vector<8x128xf32>
    %c0_151 = arith.constant 0 : index
    %c0_152 = arith.constant 0 : index
    %334 = vector.load %arg7[%c0_151, %c0_152] : memref<8x128xf32, #tpu.memory_space<vmem>>, vector<8x128xf32>
    tpu.vector_store %arg7[%c0_151, %c0_152], %333 {strides = array<i32>} : memref<8x128xf32, #tpu.memory_space<vmem>>, vector<8x128xf32>,
    %c0_153 = arith.constant 0 : index
    %c0_154 = arith.constant 0 : index
    %335 = vector.load %arg8[%c0_153, %c0_154] : memref<8x128xf32, #tpu.memory_space<vmem>>, vector<8x128xf32>
    tpu.vector_store %arg8[%c0_153, %c0_154], %331 {strides = array<i32>} : memref<8x128xf32, #tpu.memory_space<vmem>>, vector<8x128xf32>,
    %c0_155 = arith.constant 0 : index
    %336 = arith.index_cast %300 : i32 to index
    %c0_156 = arith.constant 0 : index
    %337 = vector.load %arg5[%c0_155, %336, %c0_156] : memref<1x64x128xf32, #tpu.memory_space<vmem>>, vector<1x8x128xf32>
    %338 = vector.shape_cast %337 : vector<1x8x128xf32> to vector<8x128xf32>
    %339 = vector.shape_cast %333 : vector<8x128xf32> to vector<1x8x128xf32>
    tpu.vector_store %arg5[%c0_155, %336, %c0_156], %339 {strides = array<i32>} : memref<1x64x128xf32, #tpu.memory_space<vmem>>, vector<1x8x128xf32>,
    %c8_i32_157 = arith.constant 8 : i32
    return
  }
  func.func @transform_0(%arg0: i32) -> (i32, i32, i32) {
    %c0_i32 = arith.constant 0 : i32
    %c0_i32_0 = arith.constant 0 : i32
    %c0_i32_1 = arith.constant 0 : i32
    return %arg0, %c0_i32, %c0_i32_0 : i32, i32, i32
  }
  func.func @transform_1(%arg0: i32) -> (i32, i32) {
    %c0_i32 = arith.constant 0 : i32
    %c0_i32_0 = arith.constant 0 : i32
    %c0_i32_1 = arith.constant 0 : i32
    return %c0_i32, %c0_i32_0 : i32, i32
  }
  func.func @transform_2(%arg0: i32) -> (i32, i32) {
    %c0_i32 = arith.constant 0 : i32
    %c0_i32_0 = arith.constant 0 : i32
    %c0_i32_1 = arith.constant 0 : i32
    return %c0_i32, %c0_i32_0 : i32, i32
  }
  func.func @transform_3(%arg0: i32) -> (i32, i32) {
    %c0_i32 = arith.constant 0 : i32
    %c0_i32_0 = arith.constant 0 : i32
    %c0_i32_1 = arith.constant 0 : i32
    return %c0_i32, %c0_i32_0 : i32, i32
  }
  func.func @transform_4(%arg0: i32) -> (i32, i32, i32) {
    %c0_i32 = arith.constant 0 : i32
    %c0_i32_0 = arith.constant 0 : i32
    %c0_i32_1 = arith.constant 0 : i32
    return %arg0, %c0_i32, %c0_i32_0 : i32, i32, i32
  }
}

module attributes {stable_mosaic.version = 11 : i64} {
  func.func @_output_proj_kernel(%arg0: i32, %arg1: memref<64x128xf32, #tpu.memory_space<vmem>>, %arg2: memref<128x128xbf16, #tpu.memory_space<vmem>>, %arg3: memref<1x128xf32, #tpu.memory_space<vmem>>, %arg4: memref<64x128xf32, #tpu.memory_space<vmem>>) attributes {dimension_semantics = [#tpu.dimension_semantics<parallel>], iteration_bounds = array<i64: 1>, scalar_prefetch = 0 : i64, scratch_operands = 0 : i64, tpu.core_type = #tpu.core_type<tc>, window_params = [{pipeline_mode = #tpu.pipeline_mode<synchronous>, transform_indices = @transform_0, window_bounds = array<i64: 64, 128>}, {transform_indices = @transform_1, window_bounds = array<i64: 128, 128>}, {transform_indices = @transform_2, window_bounds = array<i64: 1, 128>}, {transform_indices = @transform_3, window_bounds = array<i64: 64, 128>}]} {
    %c0 = arith.constant 0 : index
    %c0_0 = arith.constant 0 : index
    %0 = vector.load %arg1[%c0, %c0_0] : memref<64x128xf32, #tpu.memory_space<vmem>>, vector<64x128xf32>
    %1 = arith.truncf %0 : vector<64x128xf32> to vector<64x128xbf16>
    %c0_1 = arith.constant 0 : index
    %c0_2 = arith.constant 0 : index
    %2 = vector.load %arg2[%c0_1, %c0_2] : memref<128x128xbf16, #tpu.memory_space<vmem>>, vector<128x128xbf16>
    %cst = arith.constant dense<0.000000e+00> : vector<64x128xf32>
    %3 = tpu.matmul %1, %2, %cst {dimension_numbers = #tpu.dot_dimension_numbers<[1], [0], [0], [1], [0, 0, 1, 1], [], []>} : vector<64x128xbf16>, vector<128x128xbf16>, vector<64x128xf32> -> vector<64x128xf32>
    %c0_3 = arith.constant 0 : index
    %c0_4 = arith.constant 0 : index
    %4 = vector.load %arg3[%c0_3, %c0_4] : memref<1x128xf32, #tpu.memory_space<vmem>>, vector<1x128xf32>
    %5 = vector.broadcast %4 : vector<1x128xf32> to vector<64x128xf32>
    %6 = arith.addf %3, %5 : vector<64x128xf32>
    %c0_5 = arith.constant 0 : index
    %c0_6 = arith.constant 0 : index
    %7 = vector.load %arg4[%c0_5, %c0_6] : memref<64x128xf32, #tpu.memory_space<vmem>>, vector<64x128xf32>
    tpu.vector_store %arg4[%c0_5, %c0_6], %6 {strides = array<i32>} : memref<64x128xf32, #tpu.memory_space<vmem>>, vector<64x128xf32>,
    return
  }
  func.func @transform_0(%arg0: i32) -> (i32, i32) {
    %c0_i32 = arith.constant 0 : i32
    %c0_i32_0 = arith.constant 0 : i32
    %c0_i32_1 = arith.constant 0 : i32
    return %c0_i32, %c0_i32_0 : i32, i32
  }
  func.func @transform_1(%arg0: i32) -> (i32, i32) {
    %c0_i32 = arith.constant 0 : i32
    %c0_i32_0 = arith.constant 0 : i32
    return %c0_i32, %arg0 : i32, i32
  }
  func.func @transform_2(%arg0: i32) -> (i32, i32) {
    %c0_i32 = arith.constant 0 : i32
    %c0_i32_0 = arith.constant 0 : i32
    return %c0_i32, %arg0 : i32, i32
  }
  func.func @transform_3(%arg0: i32) -> (i32, i32) {
    %c0_i32 = arith.constant 0 : i32
    %c0_i32_0 = arith.constant 0 : i32
    return %c0_i32, %arg0 : i32, i32
  }
}

</mosaic_0001>

<bundles_post_ra>
// kernel: _decoder_forward.3
= control target key start
LH: loop header
LB: loop body
LE: loop exit
PB: predicated region body
PF: predicated region fallthrough
CT: control target
= control target key end

     0   :  { %s339_s1 = inlined_call_operand.vmem [shape: bf16[128,128], index: 1, kind: input, shape index: {}]   ;;  %s340_s0 = inlined_call_operand.vmem [shape: f32[64,128], index: 0, kind: input, shape index: {}]   ;;  %s341_s2 = inlined_call_operand.vmem [shape: f32[1,128], index: 2, kind: input, shape index: {}]   ;;  %s342_s3 = inlined_call_operand.vmem [shape: f32[64,128], index: 3, kind: output, shape index: {}]  }
   0x1   :  { %v236_v0 = vld [vmem:[%s339_s1] sm:$0xff]   ;;  %v237_v1 = vld [vmem:[%s339_s1 + $0x8] sm:$0xff]   ;;  %v238_v2 = vld [vmem:[%s339_s1 + $0x10] sm:$0xff]  }
   0x2   :  { %196 = vmatprep.subr.bf16.mxu0 %v236_v0  ;;  %220 = vmatprep.subr.bf16.mxu1 %v236_v0  ;;  %v239_v3 = vld [vmem:[%s339_s1 + $0x18] sm:$0xff]   ;;  %v15_v4 = vld [vmem:[%s340_s0] sm:$0xff]  ;;  %v16_v5 = vld [vmem:[%s340_s0 + $0x8] sm:$0xff] }
   0x3   :  { %197 = vmatpush3.bf16.msra.mxu0 %v236_v0  ;;  %228 = vmatpush3.bf16.msra.mxu1 %v236_v0  ;;  %v19_v6 = vld [vmem:[%s340_s0 + $0x20] sm:$0xff]  ;;  %v23_v7 = vpack.c.bf16 %v16_v5, %v15_v4  ;;  %v20_v8 = vld [vmem:[%s340_s0 + $0x28] sm:$0xff]  ;;  %v242_v12 = vld [vmem:[%s339_s1 + $0x30] sm:$0xff]  }
   0x4   :  { %198 = vmatprep.subr.bf16.mxu0 %v237_v1  ;;  %221 = vmatprep.subr.bf16.mxu1 %v237_v1  ;;  %v25_v9 = vpack.c.bf16 %v20_v8, %v19_v6  ;;  %v240_v10 = vld [vmem:[%s339_s1 + $0x20] sm:$0xff]   ;;  %v241_v11 = vld [vmem:[%s339_s1 + $0x28] sm:$0xff]   ;;  %v243_v13 = vld [vmem:[%s339_s1 + $0x38] sm:$0xff]  }
   0x5   :  { %212 = vmatprep.mubr.bf16.mxu0 %v23_v7  ;;  %v17_v14 = vld [vmem:[%s340_s0 + $0x10] sm:$0xff]  ;;  %v18_v15 = vld [vmem:[%s340_s0 + $0x18] sm:$0xff]  ;;  %v175_v20 = vld [vmem:[%s341_s2] ss:$0 sm:$0xff] }
   0x6   :  { %216 = vmatprep.mubr.bf16.mxu1 %v25_v9  ;;  %v21_v16 = vld [vmem:[%s340_s0 + $0x30] sm:$0xff]  ;;  %v22_v17 = vld [vmem:[%s340_s0 + $0x38] sm:$0xff]  ;;  %v24_v18 = vpack.c.bf16 %v18_v15, %v17_v14 }
   0x7   :  { %199 = vmatpush3.bf16.msra.mxu0 %v237_v1  ;;  %229 = vmatpush3.bf16.msra.mxu1 %v237_v1  ;;  %v26_v19 = vpack.c.bf16 %v22_v17, %v21_v16 }
   0x8   :  { %200 = vmatprep.subr.bf16.mxu0 %v238_v2  ;;  %222 = vmatprep.subr.bf16.mxu1 %v238_v2 }
   0xb   :  { %201 = vmatpush3.bf16.msra.mxu0 %v238_v2  ;;  %230 = vmatpush3.bf16.msra.mxu1 %v238_v2 }
   0xc   :  { %202 = vmatprep.subr.bf16.mxu0 %v239_v3  ;;  %223 = vmatprep.subr.bf16.mxu1 %v239_v3 }
   0xf   :  { %203 = vmatpush3.bf16.msra.mxu0 %v239_v3  ;;  %231 = vmatpush3.bf16.msra.mxu1 %v239_v3 }
  0x10   :  { %204 = vmatprep.subr.bf16.mxu0 %v240_v10  ;;  %224 = vmatprep.subr.bf16.mxu1 %v240_v10 }
  0x13   :  { %205 = vmatpush3.bf16.msra.mxu0 %v240_v10  ;;  %232 = vmatpush3.bf16.msra.mxu1 %v240_v10 }
  0x14   :  { %206 = vmatprep.subr.bf16.mxu0 %v241_v11  ;;  %225 = vmatprep.subr.bf16.mxu1 %v241_v11 }
  0x17   :  { %207 = vmatpush3.bf16.msra.mxu0 %v241_v11  ;;  %233 = vmatpush3.bf16.msra.mxu1 %v241_v11 }
  0x18   :  { %208 = vmatprep.subr.bf16.mxu0 %v242_v12  ;;  %226 = vmatprep.subr.bf16.mxu1 %v242_v12 }
  0x1b   :  { %209 = vmatpush3.bf16.msra.mxu0 %v242_v12  ;;  %234 = vmatpush3.bf16.msra.mxu1 %v242_v12 }
  0x1c   :  { %210 = vmatprep.subr.bf16.mxu0 %v243_v13  ;;  %227 = vmatprep.subr.bf16.mxu1 %v243_v13 }
  0x1f   :  { %211 = vmatpush3.bf16.msra.mxu0 %v243_v13  ;;  %235 = vmatpush3.bf16.msra.mxu1 %v243_v13 }
  0x22   :  { %213 = vmatmul.mubr.bf16.vlgmr.msra.gmra.mrb[0].mxu0 %v24_v18  ;;  %217 = vmatmul.mubr.bf16.vlgmr.msra.gmra.mrb[0].mxu1 %v26_v19 }
  0xf5   :  { %v214_v21 = vpop.f32.mrb[0].mxu0  ;;  %v218_v22 = vpop.f32.mrb[0].mxu1 }
  0xf6   :  { %v141_v23 = vadd.f32 %v214_v21, %v175_v20  ;;  %v157_v24 = vadd.f32 %v218_v22, %v175_v20  ;;  %v132_v25 = vpop.f32.mrb[1].mxu0  ;;  %v148_v26 = vpop.f32.mrb[1].mxu1 }
  0xf7   :  { %v133_v27 = vadd.f32 %v175_v20, %v132_v25  ;;  %v149_v28 = vadd.f32 %v175_v20, %v148_v26  ;;  %v215_v29 = vpop.f32.mrb[2].mxu0  ;;  %v219_v30 = vpop.f32.mrb[2].mxu1 }
  0xf8   :  { %165 = vst [vmem:[%s342_s3 + $0x10] sm:$0xff] %v141_v23  ;;  %169 = vst [vmem:[%s342_s3 + $0x30] sm:$0xff] %v157_v24  ;;  %v144_v31 = vadd.f32 %v215_v29, %v175_v20  ;;  %v160_v32 = vadd.f32 %v219_v30, %v175_v20  ;;  %v135_v33 = vpop.f32.mrb[3].mxu0  ;;  %v151_v34 = vpop.f32.mrb[3].mxu1 }
  0xf9   :  { %163 = vst [vmem:[%s342_s3] sm:$0xff] %v133_v27  ;;  %167 = vst [vmem:[%s342_s3 + $0x20] sm:$0xff] %v149_v28  ;;  %v136_v35 = vadd.f32 %v175_v20, %v135_v33  ;;  %v152_v36 = vadd.f32 %v175_v20, %v151_v34 }
  0xfa   :  { %166 = vst [vmem:[%s342_s3 + $0x18] sm:$0xff] %v144_v31  ;;  %170 = vst [vmem:[%s342_s3 + $0x38] sm:$0xff] %v160_v32 }
  0xfb   :  { %164 = vst [vmem:[%s342_s3 + $0x8] sm:$0xff] %v136_v35  ;;  %168 = vst [vmem:[%s342_s3 + $0x28] sm:$0xff] %v152_v36 }

// kernel: _decoder_forward.2
= control target key start
LH: loop header
LB: loop body
LE: loop exit
PB: predicated region body
PF: predicated region fallthrough
CT: control target
= control target key end

     0   :  { %v4233_v1 = vmov 0   ;;  %vm116_vm0 = vcmask 261120   ;;  %v3397_v45 = vmov 0.0|0.0   ;;  %v36_v46 = vlaneseq  ;;  %s4228_s1 = inlined_call_operand.vmem [shape: bf16[32,512], index: 1, kind: input, shape index: {}]   ;;  %s4229_s0 = inlined_call_operand.vmem [shape: bf16[1,64,32], index: 0, kind: input, shape index: {}]   ;;  %s4230_s2 = inlined_call_operand.vmem [shape: bf16[128,512], index: 2, kind: input, shape index: {}]   ;;  %s4231_s3 = inlined_call_operand.vmem [shape: f32[1,512], index: 3, kind: input, shape index: {}]   ;;  %s4232_s4 = inlined_call_operand.vmem [shape: f32[1,64,128], index: 4, kind: output, shape index: {}]  }
   0x1   :  { %v3156_v0 = vld [vmem:[%s4228_s1 + $0x4] ss:$16 sps:$4 sm:$0xff]   ;;  %161 = vmatprep.mubr.bf16.mxu0 %v4233_v1  ;;  %234 = vmatprep.mubr.bf16.mxu1 %v4233_v1  ;;  %v3158_v2 = vld [vmem:[%s4228_s1 + $0xc] ss:$16 sps:$4 sm:$0xff]   ;;  %v3160_v3 = vld [vmem:[%s4228_s1] ss:$16 sps:$4 sm:$0xff]  }
   0x2   :  { %129 = vmatprep.subr.bf16.mxu0 %v3156_v0  ;;  %v3161_v4 = vld [vmem:[%s4228_s1 + $0x8] ss:$16 sps:$4 sm:$0xff]   ;;  %202 = vmatprep.subr.bf16.mxu1 %v3158_v2  ;;  %v3162_v5 = vld [vmem:[%s4228_s1 + $0x24] ss:$16 sps:$4 sm:$0xff]   ;;  %v3164_v6 = vld [vmem:[%s4228_s1 + $0x2c] ss:$16 sps:$4 sm:$0xff]  }
   0x3   :  { %130 = vmatpush1.bf16.msra.mxu0 %v3160_v3  ;;  %203 = vmatpush1.bf16.msra.mxu1 %v3161_v4  ;;  %v3166_v7 = vld [vmem:[%s4228_s1 + $0x20] ss:$16 sps:$4 sm:$0xff]   ;;  %v3167_v8 = vld [vmem:[%s4228_s1 + $0x28] ss:$16 sps:$4 sm:$0xff]   ;;  %v3460_v11 = vld [vmem:[%s4230_s2 + $0x4] ss:$16 sps:$4 sm:$0xff]  }
   0x4   :  { %131 = vmatprep.subr.bf16.mxu0 %v3162_v5  ;;  %204 = vmatprep.subr.bf16.mxu1 %v3164_v6  ;;  %v3168_v9 = vld [vmem:[%s4229_s0] sm:$0xff]   ;;  %v3465_v12 = vld [vmem:[%s4230_s2 + $0x8] ss:$16 sps:$4 sm:$0xff]   ;;  %v3470_v13 = vld [vmem:[%s4230_s2 + $0xc] ss:$16 sps:$4 sm:$0xff]   ;;  %v37_v47 = vshrl.u32 %v36_v46, 7 }
   0x5   :  { %v3455_v10 = vld [vmem:[%s4230_s2] ss:$16 sps:$4 sm:$0xff]   ;;  %v3477_v14 = vld [vmem:[%s4230_s2 + $0x24] ss:$16 sps:$4 sm:$0xff]   ;;  %v3489_v16 = vld [vmem:[%s4230_s2 + $0x2c] ss:$16 sps:$4 sm:$0xff]  }
   0x6   :  { %v3484_v15 = vld [vmem:[%s4230_s2 + $0x20] ss:$16 sps:$4 sm:$0xff]   ;;  %v3496_v17 = vld [vmem:[%s4230_s2 + $0x28] ss:$16 sps:$4 sm:$0xff]   ;;  %v3503_v18 = vld [vmem:[%s4230_s2 + $0x44] ss:$16 sps:$4 sm:$0xff]  }
   0x7   :  { %132 = vmatpush1.bf16.msra.mxu0 %v3166_v7  ;;  %205 = vmatpush1.bf16.msra.mxu1 %v3167_v8  ;;  %v3181_v19 = vld [vmem:[%s4229_s0 + $0x8] sm:$0xff]   ;;  %v3520_v21 = vld [vmem:[%s4230_s2 + $0x40] ss:$16 sps:$4 sm:$0xff]   ;;  %v3532_v23 = vld [vmem:[%s4230_s2 + $0x64] ss:$16 sps:$4 sm:$0xff]   ;;  %v46_v48 = vsub.s32 2, %v37_v47 }
   0x8   :  { %511 = vmatprep.subr.bf16.mxu0 %v3460_v11  ;;  %552 = vmatprep.subr.bf16.mxu1 %v3470_v13  ;;  %v3513_v20 = vld [vmem:[%s4230_s2 + $0x4c] ss:$16 sps:$4 sm:$0xff]   ;;  %v3525_v22 = vld [vmem:[%s4230_s2 + $0x48] ss:$16 sps:$4 sm:$0xff]   ;;  %v3544_v25 = vld [vmem:[%s4230_s2 + $0x60] ss:$16 sps:$4 sm:$0xff]  }
   0x9   :  { %v3537_v24 = vld [vmem:[%s4230_s2 + $0x6c] ss:$16 sps:$4 sm:$0xff]   ;;  %v3551_v26 = vld [vmem:[%s4230_s2 + $0x68] ss:$16 sps:$4 sm:$0xff]   ;;  %v3558_v27 = vld [vmem:[%s4230_s2 + $0x84] ss:$16 sps:$4 sm:$0xff]  }
   0xa   :  { %2859 = vmatmul.mubr.msk.bf16.vlgmr.msra.gmra.mrb[0].mxu0 %vm116_vm0, %v3168_v9  ;;  %2863 = vmatmul.mubr.msk.bf16.vlgmr.msra.gmra.mrb[0].mxu1 %vm116_vm0, %v3168_v9  ;;  %v3563_v28 = vld [vmem:[%s4230_s2 + $0x8c] ss:$16 sps:$4 sm:$0xff]   ;;  %v3194_v29 = vld [vmem:[%s4229_s0 + $0x10] sm:$0xff]   ;;  %v3578_v31 = vld [vmem:[%s4230_s2 + $0x88] ss:$16 sps:$4 sm:$0xff]   ;;  %v50_v49 = vsub.s32 3, %v37_v47 }
   0xb   :  { %512 = vmatpush1.bf16.msra.mxu0 %v3455_v10  ;;  %553 = vmatpush1.bf16.msra.mxu1 %v3465_v12  ;;  %v3573_v30 = vld [vmem:[%s4230_s2 + $0x80] ss:$16 sps:$4 sm:$0xff]   ;;  %v3585_v32 = vld [vmem:[%s4230_s2 + $0xa4] ss:$16 sps:$4 sm:$0xff]   ;;  %v3592_v33 = vld [vmem:[%s4230_s2 + $0xac] ss:$16 sps:$4 sm:$0xff]  }
   0xc   :  { %513 = vmatprep.subr.bf16.mxu0 %v3477_v14  ;;  %554 = vmatprep.subr.bf16.mxu1 %v3489_v16  ;;  %v3599_v34 = vld [vmem:[%s4230_s2 + $0xa0] ss:$16 sps:$4 sm:$0xff]   ;;  %v3604_v35 = vld [vmem:[%s4230_s2 + $0xa8] ss:$16 sps:$4 sm:$0xff]   ;;  %v3611_v36 = vld [vmem:[%s4230_s2 + $0xc4] ss:$16 sps:$4 sm:$0xff]  }
   0xd   :  { %171 = vmatprep.mubr.bf16.mxu0 %v4233_v1  ;;  %244 = vmatprep.mubr.bf16.mxu1 %v4233_v1  ;;  %v3618_v37 = vld [vmem:[%s4230_s2 + $0xcc] ss:$16 sps:$4 sm:$0xff]   ;;  %v3628_v39 = vld [vmem:[%s4230_s2 + $0xc0] ss:$16 sps:$4 sm:$0xff]   ;;  %v3633_v40 = vld [vmem:[%s4230_s2 + $0xc8] ss:$16 sps:$4 sm:$0xff]  }
   0xe   :  { %v3207_v38 = vld [vmem:[%s4229_s0 + $0x18] sm:$0xff]   ;;  %v3638_v41 = vld [vmem:[%s4230_s2 + $0xe4] ss:$16 sps:$4 sm:$0xff]   ;;  %v3652_v43 = vld [vmem:[%s4230_s2 + $0xe0] ss:$16 sps:$4 sm:$0xff]   ;;  %v38_v50 = vsub.s32 0, %v37_v47 }
   0xf   :  { %514 = vmatpush1.bf16.msra.mxu0 %v3484_v15  ;;  %555 = vmatpush1.bf16.msra.mxu1 %v3496_v17  ;;  %v3643_v42 = vld [vmem:[%s4230_s2 + $0xec] ss:$16 sps:$4 sm:$0xff]   ;;  %v3657_v44 = vld [vmem:[%s4230_s2 + $0xe8] ss:$16 sps:$4 sm:$0xff]   ;;  %v34_v51 = vld [vmem:[%s4231_s3] sm:$0xf] }
  0x10   :  { %515 = vmatprep.subr.bf16.mxu0 %v3503_v18  ;;  %556 = vmatprep.subr.bf16.mxu1 %v3513_v20  ;;  %v42_v52 = vsub.s32 1, %v37_v47  ;;  %v3708_v53 = vrot.slane %v34_v51, %v46_v48  ;;  %v3714_v56 = vrot.slane %v34_v51, %v50_v49  ;;  %v39_v57 = vrot.slane %v34_v51, %v38_v50 }
  0x12   :  { %2860 = vmatmul.mubr.msk.bf16.gmra.mrb[4].mxu0 %vm116_vm0, %v3181_v19  ;;  %2864 = vmatmul.mubr.msk.bf16.gmra.mrb[4].mxu1 %vm116_vm0, %v3181_v19  ;;  %v43_v60 = vrot.slane %v34_v51, %v42_v52 }
  0x13   :  { %516 = vmatpush1.bf16.msra.mxu0 %v3520_v21  ;;  %557 = vmatpush1.bf16.msra.mxu1 %v3525_v22 }
  0x14   :  { %517 = vmatprep.subr.bf16.mxu0 %v3532_v23  ;;  %558 = vmatprep.subr.bf16.mxu1 %v3537_v24 }
  0x15   :  { %181 = vmatprep.mubr.bf16.mxu0 %v4233_v1  ;;  %254 = vmatprep.mubr.bf16.mxu1 %v4233_v1 }
  0x17   :  { %518 = vmatpush1.bf16.msra.mxu0 %v3544_v25  ;;  %559 = vmatpush1.bf16.msra.mxu1 %v3551_v26 }
  0x18   :  { %519 = vmatprep.subr.bf16.mxu0 %v3558_v27  ;;  %560 = vmatprep.subr.bf16.mxu1 %v3563_v28 }
  0x1a   :  { %2861 = vmatmul.mubr.msk.bf16.gmra.mrb[8].mxu0 %vm116_vm0, %v3194_v29  ;;  %2865 = vmatmul.mubr.msk.bf16.gmra.mrb[8].mxu1 %vm116_vm0, %v3194_v29 }
  0x1b   :  { %520 = vmatpush1.bf16.msra.mxu0 %v3573_v30  ;;  %561 = vmatpush1.bf16.msra.mxu1 %v3578_v31 }
  0x1c   :  { %521 = vmatprep.subr.bf16.mxu0 %v3585_v32  ;;  %562 = vmatprep.subr.bf16.mxu1 %v3592_v33 }
  0x1d   :  { %191 = vmatprep.mubr.bf16.mxu0 %v4233_v1  ;;  %264 = vmatprep.mubr.bf16.mxu1 %v4233_v1 }
  0x1f   :  { %522 = vmatpush1.bf16.msra.mxu0 %v3599_v34  ;;  %563 = vmatpush1.bf16.msra.mxu1 %v3604_v35 }
  0x20   :  { %523 = vmatprep.subr.bf16.mxu0 %v3611_v36  ;;  %564 = vmatprep.subr.bf16.mxu1 %v3618_v37 }
  0x22   :  { %2862 = vmatmul.mubr.msk.bf16.gmra.mrb[12].mxu0 %vm116_vm0, %v3207_v38  ;;  %2866 = vmatmul.mubr.msk.bf16.gmra.mrb[12].mxu1 %vm116_vm0, %v3207_v38 }
  0x23   :  { %524 = vmatpush1.bf16.msra.mxu0 %v3628_v39  ;;  %565 = vmatpush1.bf16.msra.mxu1 %v3633_v40 }
  0x24   :  { %525 = vmatprep.subr.bf16.mxu0 %v3638_v41  ;;  %566 = vmatprep.subr.bf16.mxu1 %v3643_v42 }
  0x25   :  { %543 = vmatprep.mubr.bf16.mxu0 %v4233_v1  ;;  %584 = vmatprep.mubr.bf16.mxu1 %v4233_v1 }
  0x27   :  { %526 = vmatpush1.bf16.msra.mxu0 %v3652_v43  ;;  %567 = vmatpush1.bf16.msra.mxu1 %v3657_v44 }
  0x28   :  { %826 = vmatprep.subr.bf16.mxu0 %v3460_v11  ;;  %867 = vmatprep.subr.bf16.mxu1 %v3470_v13 }
  0x2a   :  { %544 = vmatmul.mubr.bf16.vlgmr.msra.gmra.mrb[16].mxu0 %v3397_v45  ;;  %585 = vmatmul.mubr.bf16.vlgmr.msra.gmra.mrb[16].mxu1 %v3397_v45 }
  0x2b   :  { %827 = vmatpush1.bf16.msra.mxu0 %v3455_v10  ;;  %868 = vmatpush1.bf16.msra.mxu1 %v3465_v12 }
  0x2c   :  { %828 = vmatprep.subr.bf16.mxu0 %v3477_v14  ;;  %869 = vmatprep.subr.bf16.mxu1 %v3489_v16 }
  0x2d   :  { %858 = vmatprep.mubr.bf16.mxu0 %v4233_v1  ;;  %899 = vmatprep.mubr.bf16.mxu1 %v4233_v1 }
  0x2f   :  { %829 = vmatpush1.bf16.msra.mxu0 %v3484_v15  ;;  %870 = vmatpush1.bf16.msra.mxu1 %v3496_v17 }
  0x30   :  { %830 = vmatprep.subr.bf16.mxu0 %v3503_v18  ;;  %871 = vmatprep.subr.bf16.mxu1 %v3513_v20 }
  0x33   :  { %831 = vmatpush1.bf16.msra.mxu0 %v3520_v21  ;;  %872 = vmatpush1.bf16.msra.mxu1 %v3525_v22 }
  0x34   :  { %832 = vmatprep.subr.bf16.mxu0 %v3532_v23  ;;  %873 = vmatprep.subr.bf16.mxu1 %v3537_v24 }
  0x37   :  { %833 = vmatpush1.bf16.msra.mxu0 %v3544_v25  ;;  %874 = vmatpush1.bf16.msra.mxu1 %v3551_v26 }
  0x38   :  { %834 = vmatprep.subr.bf16.mxu0 %v3558_v27  ;;  %875 = vmatprep.subr.bf16.mxu1 %v3563_v28 }
  0x3b   :  { %835 = vmatpush1.bf16.msra.mxu0 %v3573_v30  ;;  %876 = vmatpush1.bf16.msra.mxu1 %v3578_v31 }
  0x3c   :  { %836 = vmatprep.subr.bf16.mxu0 %v3585_v32  ;;  %877 = vmatprep.subr.bf16.mxu1 %v3592_v33 }
  0x3f   :  { %837 = vmatpush1.bf16.msra.mxu0 %v3599_v34  ;;  %878 = vmatpush1.bf16.msra.mxu1 %v3604_v35 }
  0x40   :  { %838 = vmatprep.subr.bf16.mxu0 %v3611_v36  ;;  %879 = vmatprep.subr.bf16.mxu1 %v3618_v37 }
  0x43   :  { %839 = vmatpush1.bf16.msra.mxu0 %v3628_v39  ;;  %880 = vmatpush1.bf16.msra.mxu1 %v3633_v40 }
  0x44   :  { %840 = vmatprep.subr.bf16.mxu0 %v3638_v41  ;;  %881 = vmatprep.subr.bf16.mxu1 %v3643_v42 }
  0x47   :  { %841 = vmatpush1.bf16.msra.mxu0 %v3652_v43  ;;  %882 = vmatpush1.bf16.msra.mxu1 %v3657_v44 }
  0x48   :  { %1142 = vmatprep.subr.bf16.mxu0 %v3460_v11  ;;  %1183 = vmatprep.subr.bf16.mxu1 %v3470_v13 }
  0xdd   :  { %v3710_v54 = vpop.f32.mrb[0].mxu0  ;;  %v3712_v55 = vpop.f32.mrb[0].mxu1 }
  0xde   :  { %v165_v58 = vpop.f32.mrb[1].mxu0  ;;  %v238_v59 = vpop.f32.mrb[1].mxu1 }
  0xdf   :  { %v167_v61 = vpop.f32.mrb[2].mxu0  ;;  %v240_v62 = vpop.f32.mrb[2].mxu1 }
  0xe0   :  { %v3716_v63 = vadd.f32 %v167_v61, %v39_v57  ;;  %v169_v0 = vpop.f32.mrb[3].mxu0  ;;  %v3719_v2 = vadd.f32 %v240_v62, %v3708_v53  ;;  %v242_v3 = vpop.f32.mrb[3].mxu1 }
  0xe1   :  { %v3721_v4 = vadd.f32 %v169_v0, %v43_v60  ;;  %v3724_v5 = vadd.f32 %v242_v3, %v3714_v56 }
  0xe5   :  { %v173_v6 = vpop.f32.mrb[4].mxu0  ;;  %v246_v7 = vpop.f32.mrb[4].mxu1 }
  0xe6   :  { %v3726_v8 = vadd.f32 %v173_v6, %v39_v57  ;;  %v175_v9 = vpop.f32.mrb[5].mxu0  ;;  %v3729_v19 = vadd.f32 %v246_v7, %v3708_v53  ;;  %v248_v29 = vpop.f32.mrb[5].mxu1 }
  0xe7   :  { %v3731_v38 = vadd.f32 %v175_v9, %v43_v60  ;;  %v177_v45 = vpop.f32.mrb[6].mxu0  ;;  %v3734_v46 = vadd.f32 %v248_v29, %v3714_v56  ;;  %v250_v47 = vpop.f32.mrb[6].mxu1 }
  0xe8   :  { %v3736_v48 = vadd.f32 %v177_v45, %v39_v57  ;;  %v179_v49 = vpop.f32.mrb[7].mxu0  ;;  %v3739_v50 = vadd.f32 %v250_v47, %v3708_v53  ;;  %v252_v51 = vpop.f32.mrb[7].mxu1 }
  0xe9   :  { %4235 = vst [vmem:[#allocation5_spill] sm:$0xff] %v3734_v46  ;;  %v3741_v52 = vadd.f32 %v179_v49, %v43_v60  ;;  %v3744_v61 = vadd.f32 %v252_v51, %v3714_v56 }
  0xea   :  { %4236 = vst [vmem:[#allocation6_spill] sm:$0xff] %v3736_v48  ;;  %4237 = vst [vmem:[#allocation7_spill] sm:$0xff] %v3739_v50 }
  0xeb   :  { %4238 = vst [vmem:[#allocation8_spill] sm:$0xff] %v3741_v52  ;;  %4239 = vst [vmem:[#allocation9_spill] sm:$0xff] %v3744_v61 }
  0xed   :  { %v183_v62 = vpop.f32.mrb[8].mxu0  ;;  %v256_v0 = vpop.f32.mrb[8].mxu1 }
  0xee   :  { %v3746_v3 = vadd.f32 %v183_v62, %v39_v57  ;;  %v185_v6 = vpop.f32.mrb[9].mxu0  ;;  %v3749_v7 = vadd.f32 %v256_v0, %v3708_v53  ;;  %v258_v9 = vpop.f32.mrb[9].mxu1 }
  0xef   :  { %v3751_v29 = vadd.f32 %v185_v6, %v43_v60  ;;  %v187_v45 = vpop.f32.mrb[10].mxu0  ;;  %v3754_v47 = vadd.f32 %v258_v9, %v3714_v56  ;;  %v260_v49 = vpop.f32.mrb[10].mxu1 }
  0xf0   :  { %4240 = vst [vmem:[#allocation10_spill] sm:$0xff] %v3746_v3  ;;  %4241 = vst [vmem:[#allocation11_spill] sm:$0xff] %v3749_v7  ;;  %v3756_v1 = vadd.f32 %v187_v45, %v39_v57  ;;  %v189_v51 = vpop.f32.mrb[11].mxu0  ;;  %v3759_v61 = vadd.f32 %v260_v49, %v3708_v53  ;;  %v262_v62 = vpop.f32.mrb[11].mxu1 }
  0xf1   :  { %4242 = vst [vmem:[#allocation12_spill] sm:$0xff] %v3751_v29  ;;  %4243 = vst [vmem:[#allocation13_spill] sm:$0xff] %v3754_v47  ;;  %v3761_v3 = vadd.f32 %v189_v51, %v43_v60  ;;  %v3764_v0 = vadd.f32 %v262_v62, %v3714_v56 }
  0xf2   :  { %4244 = vst [vmem:[#allocation14_spill] sm:$0xff] %v3756_v1  ;;  %4245 = vst [vmem:[#allocation15_spill] sm:$0xff] %v3759_v61 }
  0xf3   :  { %4246 = vst [vmem:[#allocation16_spill] sm:$0xff] %v3761_v3  ;;  %4247 = vst [vmem:[#allocation17_spill] sm:$0xff] %v3764_v0 }
  0xf5   :  { %v193_v7 = vpop.f32.mrb[12].mxu0  ;;  %v266_v6 = vpop.f32.mrb[12].mxu1 }
  0xf6   :  { %v3766_v29 = vadd.f32 %v193_v7, %v39_v57  ;;  %v195_v52 = vpop.f32.mrb[13].mxu0  ;;  %v3769_v9 = vadd.f32 %v266_v6, %v3708_v53  ;;  %v268_v45 = vpop.f32.mrb[13].mxu1 }
  0xf7   :  { %v3771_v1 = vadd.f32 %v195_v52, %v43_v60  ;;  %v197_v47 = vpop.f32.mrb[14].mxu0  ;;  %v3774_v49 = vadd.f32 %v268_v45, %v3714_v56  ;;  %v270_v51 = vpop.f32.mrb[14].mxu1  ;;  %v164_v52 = vadd.f32 %v3710_v54, %v39_v57  ;;  %v166_v45 = vadd.f32 %v165_v58, %v43_v60 }
  0xf8   :  { %4248 = vst [vmem:[#allocation18_spill] sm:$0xff] %v3766_v29  ;;  %4249 = vst [vmem:[#allocation19_spill] sm:$0xff] %v3769_v9  ;;  %v3776_v3 = vadd.f32 %v197_v47, %v39_v57  ;;  %v199_v62 = vpop.f32.mrb[15].mxu0  ;;  %v3779_v0 = vadd.f32 %v270_v51, %v3708_v53  ;;  %v272_v7 = vpop.f32.mrb[15].mxu1 }
  0xf9   :  { %4250 = vst [vmem:[#allocation20_spill] sm:$0xff] %v3771_v1  ;;  %4251 = vst [vmem:[#allocation21_spill] sm:$0xff] %v3774_v49  ;;  %v3781_v29 = vadd.f32 %v199_v62, %v43_v60  ;;  %v3784_v6 = vadd.f32 %v272_v7, %v3714_v56  ;;  %v237_v1 = vadd.f32 %v3712_v55, %v3708_v53 }
  0xfa   :  { %4252 = vst [vmem:[#allocation22_spill] sm:$0xff] %v3776_v3  ;;  %4253 = vst [vmem:[#allocation23_spill] sm:$0xff] %v3779_v0  ;;  %v239_v49 = vadd.f32 %v238_v59, %v3714_v56 }
  0xfb   :  { %4254 = vst [vmem:[#allocation24_spill] sm:$0xff] %v3781_v29  ;;  %4255 = vst [vmem:[#allocation25_spill] sm:$0xff] %v3784_v6 }
  0xfd   :  { %v545_v47 = vpop.f32.mrb[16].mxu0  ;;  %v586_v3 = vpop.f32.mrb[16].mxu1 }
  0xfe   :  { %v593_v9 = vadd.f32 %v545_v47, %v164_v52  ;;  %v595_v61 = vadd.f32 %v586_v3, %v237_v1  ;;  %v547_v51 = vpop.f32.mrb[17].mxu0  ;;  %v588_v0 = vpop.f32.mrb[17].mxu1 }
  0xff   :  { %v594_v50 = vadd.f32 %v547_v51, %v166_v45  ;;  %v596_v62 = vadd.f32 %v588_v0, %v239_v49  ;;  %v549_v29 = vpop.f32.mrb[18].mxu0  ;;  %v590_v48 = vpop.f32.mrb[18].mxu1 }
 0x100   :  { %v2899_v7 = vmul.f32 -1.442695, %v593_v9  ;;  %v550_v6 = vpop.f32.mrb[19].mxu0  ;;  %v591_v46 = vpop.f32.mrb[19].mxu1 }
 0x101   :  { %v2900_v54 = vmul.f32 -1.442695, %v594_v50  ;;  %v2901_v53 = vmul.f32 -1.442695, %v596_v62  ;;  %v4256_v6 = vmov 0  }
 0x102   :  { %3268 = vpow2.f32 %v2899_v7 }
 0x103   :  { %3270 = vpow2.f32 %v2900_v54 }
 0x104   :  { %3272 = vpow2.f32 %v2901_v53 }
 0x105   :  { %3274 = vtanh.f32 %v595_v61 }
 0x10c   :  { %v3269_v55 = vpop.eup %3268 }
 0x10d   :  { %v3271_v57 = vpop.eup %3270  ;;  %v600_v56 = vadd.f32 1.0, %v3269_v55 }
 0x10e   :  { %v606_v58 = vadd.f32 1.0, %v3271_v57  ;;  %v3273_v1 = vpop.eup %3272 }
 0x10f   :  { %3276 = vrcp.f32 %v600_v56  ;;  %v3275_v59 = vpop.eup %3274  ;;  %v613_v29 = vadd.f32 1.0, %v3273_v1 }
 0x110   :  { %3278 = vrcp.f32 %v606_v58 }
 0x111   :  { %3280 = vrcp.f32 %v613_v29 }
 0x119   :  { %v3277_v60 = vpop.eup %3276 }
 0x11a   :  { %v3279_v3 = vpop.eup %3278  ;;  %v617_v48 = vmul.f32 %v3277_v60, %v3275_v59 }
 0x11b   :  { %v616_v0 = vmul.f32 0.0, %v3279_v3  ;;  %v3281_v50 = vpop.eup %3280 }
 0x11d   :  { %v3790_v46 = vadd.f32 %v617_v48, %v616_v0 }
 0x11f   :  { %3282 = vtanh.f32 %v3790_v46 }
 0x129   :  { %v3283_v9 = vpop.eup %3282 }
 0x12a   :  { %v620_v49 = vmul.f32 %v3283_v9, %v3281_v50 }
 0x12c   :  { %623 = vst [vmem:[%s4232_s4] sm:$0xff] %v620_v49  ;;  %v633_v61 = vpack.c.bf16 %v620_v49, %v620_v49 }
 0x12e   :  { %859 = vmatmul.mubr.bf16.vlgmr.msra.gmra.mrb[20].mxu0 %v633_v61  ;;  %900 = vmatmul.mubr.bf16.vlgmr.msra.gmra.mrb[20].mxu1 %v633_v61 }
 0x12f   :  { %1143 = vmatpush1.bf16.msra.mxu0 %v3455_v10  ;;  %1184 = vmatpush1.bf16.msra.mxu1 %v3465_v12 }
 0x130   :  { %1144 = vmatprep.subr.bf16.mxu0 %v3477_v14  ;;  %1185 = vmatprep.subr.bf16.mxu1 %v3489_v16 }
 0x131   :  { %1174 = vmatprep.mubr.bf16.mxu0 %v4256_v6  ;;  %1215 = vmatprep.mubr.bf16.mxu1 %v4256_v6 }
 0x133   :  { %1145 = vmatpush1.bf16.msra.mxu0 %v3484_v15  ;;  %1186 = vmatpush1.bf16.msra.mxu1 %v3496_v17 }
 0x134   :  { %1146 = vmatprep.subr.bf16.mxu0 %v3503_v18  ;;  %1187 = vmatprep.subr.bf16.mxu1 %v3513_v20 }
 0x137   :  { %1147 = vmatpush1.bf16.msra.mxu0 %v3520_v21  ;;  %1188 = vmatpush1.bf16.msra.mxu1 %v3525_v22 }
 0x138   :  { %1148 = vmatprep.subr.bf16.mxu0 %v3532_v23  ;;  %1189 = vmatprep.subr.bf16.mxu1 %v3537_v24 }
 0x13b   :  { %1149 = vmatpush1.bf16.msra.mxu0 %v3544_v25  ;;  %1190 = vmatpush1.bf16.msra.mxu1 %v3551_v26 }
 0x13c   :  { %1150 = vmatprep.subr.bf16.mxu0 %v3558_v27  ;;  %1191 = vmatprep.subr.bf16.mxu1 %v3563_v28 }
 0x13f   :  { %1151 = vmatpush1.bf16.msra.mxu0 %v3573_v30  ;;  %1192 = vmatpush1.bf16.msra.mxu1 %v3578_v31 }
 0x140   :  { %1152 = vmatprep.subr.bf16.mxu0 %v3585_v32  ;;  %1193 = vmatprep.subr.bf16.mxu1 %v3592_v33 }
 0x143   :  { %1153 = vmatpush1.bf16.msra.mxu0 %v3599_v34  ;;  %1194 = vmatpush1.bf16.msra.mxu1 %v3604_v35 }
 0x144   :  { %1154 = vmatprep.subr.bf16.mxu0 %v3611_v36  ;;  %1195 = vmatprep.subr.bf16.mxu1 %v3618_v37 }
 0x147   :  { %1155 = vmatpush1.bf16.msra.mxu0 %v3628_v39  ;;  %1196 = vmatpush1.bf16.msra.mxu1 %v3633_v40 }
 0x148   :  { %1156 = vmatprep.subr.bf16.mxu0 %v3638_v41  ;;  %1197 = vmatprep.subr.bf16.mxu1 %v3643_v42 }
 0x14b   :  { %1157 = vmatpush1.bf16.msra.mxu0 %v3652_v43  ;;  %1198 = vmatpush1.bf16.msra.mxu1 %v3657_v44 }
 0x14c   :  { %1458 = vmatprep.subr.bf16.mxu0 %v3460_v11  ;;  %1499 = vmatprep.subr.bf16.mxu1 %v3470_v13 }
 0x201   :  { %v860_v52 = vpop.f32.mrb[20].mxu0  ;;  %v901_v45 = vpop.f32.mrb[20].mxu1 }
 0x202   :  { %v908_v47 = vadd.f32 %v860_v52, %v3716_v63  ;;  %v910_v51 = vadd.f32 %v901_v45, %v3719_v2  ;;  %v862_v62 = vpop.f32.mrb[21].mxu0  ;;  %v903_v7 = vpop.f32.mrb[21].mxu1 }
 0x203   :  { %v909_v54 = vadd.f32 %v862_v62, %v3721_v4  ;;  %v911_v53 = vadd.f32 %v903_v7, %v3724_v5  ;;  %v864_v55 = vpop.f32.mrb[22].mxu0  ;;  %v905_v57 = vpop.f32.mrb[22].mxu1  ;;  %v3913_v62 = vld [vmem:[%s4230_s2 + $0x24] ss:$16 sps:$4 sm:$0xff]   ;;  %v3918_v7 = vld [vmem:[%s4230_s2 + $0x2c] ss:$16 sps:$4 sm:$0xff]  }
 0x204   :  { %v2934_v56 = vmul.f32 -1.442695, %v908_v47  ;;  %v865_v58 = vpop.f32.mrb[23].mxu0  ;;  %v906_v1 = vpop.f32.mrb[23].mxu1  ;;  %v3899_v47 = vld [vmem:[%s4230_s2] ss:$16 sps:$4 sm:$0xff]  }
 0x205   :  { %v2935_v11 = vmul.f32 -1.442695, %v909_v54  ;;  %v2936_v13 = vmul.f32 -1.442695, %v911_v53  ;;  %v3923_v54 = vld [vmem:[%s4230_s2 + $0x20] ss:$16 sps:$4 sm:$0xff]  }
 0x206   :  { %3284 = vpow2.f32 %v2934_v56  ;;  %v3928_v53 = vld [vmem:[%s4230_s2 + $0x28] ss:$16 sps:$4 sm:$0xff]   ;;  %v3937_v55 = vld [vmem:[%s4230_s2 + $0x44] ss:$16 sps:$4 sm:$0xff]   ;;  %v3942_v57 = vld [vmem:[%s4230_s2 + $0x4c] ss:$16 sps:$4 sm:$0xff]  }
 0x207   :  { %3286 = vpow2.f32 %v2935_v11  ;;  %v3947_v56 = vld [vmem:[%s4230_s2 + $0x40] ss:$16 sps:$4 sm:$0xff]   ;;  %v3952_v58 = vld [vmem:[%s4230_s2 + $0x48] ss:$16 sps:$4 sm:$0xff]   ;;  %v3961_v1 = vld [vmem:[%s4230_s2 + $0x64] ss:$16 sps:$4 sm:$0xff]  }
 0x208   :  { %3288 = vpow2.f32 %v2936_v13  ;;  %v3966_v11 = vld [vmem:[%s4230_s2 + $0x6c] ss:$16 sps:$4 sm:$0xff]   ;;  %v3971_v13 = vld [vmem:[%s4230_s2 + $0x60] ss:$16 sps:$4 sm:$0xff]  }
 0x209   :  { %3290 = vtanh.f32 %v910_v51  ;;  %v3904_v51 = vld [vmem:[%s4230_s2 + $0x8] ss:$16 sps:$4 sm:$0xff]  }
 0x210   :  { %v3285_v59 = vpop.eup %3284 }
 0x211   :  { %v3287_v60 = vpop.eup %3286  ;;  %v915_v63 = vadd.f32 1.0, %v3285_v59  ;;  %v3976_v59 = vld [vmem:[%s4230_s2 + $0x68] ss:$16 sps:$4 sm:$0xff]  }
 0x212   :  { %v921_v2 = vadd.f32 1.0, %v3287_v60  ;;  %v3289_v4 = vpop.eup %3288  ;;  %v3985_v60 = vld [vmem:[%s4230_s2 + $0x84] ss:$16 sps:$4 sm:$0xff]  }
 0x213   :  { %3292 = vrcp.f32 %v915_v63  ;;  %v3291_v3 = vpop.eup %3290  ;;  %v928_v0 = vadd.f32 1.0, %v3289_v4  ;;  %v3990_v63 = vld [vmem:[%s4230_s2 + $0x8c] ss:$16 sps:$4 sm:$0xff]   ;;  %v4000_v4 = vld [vmem:[%s4230_s2 + $0x88] ss:$16 sps:$4 sm:$0xff]  }
 0x214   :  { %3294 = vrcp.f32 %v921_v2  ;;  %v3995_v2 = vld [vmem:[%s4230_s2 + $0x80] ss:$16 sps:$4 sm:$0xff]  }
 0x215   :  { %3296 = vrcp.f32 %v928_v0  ;;  %v4030_v0 = vld [vmem:[%s4230_s2 + $0xc4] ss:$16 sps:$4 sm:$0xff]  }
 0x21d   :  { %v3293_v5 = vpop.eup %3292 }
 0x21e   :  { %v3295_v48 = vpop.eup %3294  ;;  %v932_v29 = vmul.f32 %v3293_v5, %v3291_v3  ;;  %v4007_v3 = vld [vmem:[%s4230_s2 + $0xa4] ss:$16 sps:$4 sm:$0xff]   ;;  %v4014_v5 = vld [vmem:[%s4230_s2 + $0xa0] ss:$16 sps:$4 sm:$0xff]  }
 0x21f   :  { %v931_v50 = vmul.f32 %v3295_v48, %v3790_v46  ;;  %v3297_v49 = vpop.eup %3296  ;;  %v3894_v46 = vld [vmem:[%s4230_s2 + $0xc] ss:$16 sps:$4 sm:$0xff]   ;;  %v4019_v48 = vld [vmem:[%s4230_s2 + $0xa8] ss:$16 sps:$4 sm:$0xff]  }
 0x221   :  { %v3835_v9 = vadd.f32 %v932_v29, %v931_v50  ;;  %v4024_v29 = vld [vmem:[%s4230_s2 + $0xac] ss:$16 sps:$4 sm:$0xff]  }
 0x222   :  { %v4035_v50 = vld [vmem:[%s4230_s2 + $0xcc] ss:$16 sps:$4 sm:$0xff]  }
 0x223   :  { %3298 = vtanh.f32 %v3835_v9 }
 0x22d   :  { %v3299_v61 = vpop.eup %3298 }
 0x22e   :  { %v935_v52 = vmul.f32 %v3299_v61, %v3297_v49  ;;  %v4048_v49 = vld [vmem:[%s4230_s2 + $0xc8] ss:$16 sps:$4 sm:$0xff]   ;;  %v4055_v61 = vld [vmem:[%s4230_s2 + $0xe4] ss:$16 sps:$4 sm:$0xff]  }
 0x230   :  { %2937 = vst [vmem:[%s4232_s4 + $0x8] sm:$0xff] %v935_v52  ;;  %v949_v45 = vpack.c.bf16 %v935_v52, %v935_v52  ;;  %v4060_v52 = vld [vmem:[%s4230_s2 + $0xec] ss:$16 sps:$4 sm:$0xff]  }
 0x232   :  { %1175 = vmatmul.mubr.bf16.vlgmr.msra.gmra.mrb[24].mxu0 %v949_v45  ;;  %1216 = vmatmul.mubr.bf16.vlgmr.msra.gmra.mrb[24].mxu1 %v949_v45  ;;  %v4067_v45 = vld [vmem:[%s4230_s2 + $0xe0] ss:$16 sps:$4 sm:$0xff]  }
 0x233   :  { %1459 = vmatpush1.bf16.msra.mxu0 %v3455_v10  ;;  %1500 = vmatpush1.bf16.msra.mxu1 %v3465_v12 }
 0x234   :  { %1460 = vmatprep.subr.bf16.mxu0 %v3477_v14  ;;  %1501 = vmatprep.subr.bf16.mxu1 %v3489_v16 }
 0x235   :  { %1490 = vmatprep.mubr.bf16.mxu0 %v4256_v6  ;;  %1531 = vmatprep.mubr.bf16.mxu1 %v4256_v6 }
 0x237   :  { %1461 = vmatpush1.bf16.msra.mxu0 %v3484_v15  ;;  %1502 = vmatpush1.bf16.msra.mxu1 %v3496_v17 }
 0x238   :  { %1462 = vmatprep.subr.bf16.mxu0 %v3503_v18  ;;  %1503 = vmatprep.subr.bf16.mxu1 %v3513_v20  ;;  %v4257_v20 = vld [vmem:[#allocation5_spill] sm:$0xff] }
 0x23b   :  { %1463 = vmatpush1.bf16.msra.mxu0 %v3520_v21  ;;  %1504 = vmatpush1.bf16.msra.mxu1 %v3525_v22 }
 0x23c   :  { %1464 = vmatprep.subr.bf16.mxu0 %v3532_v23  ;;  %1505 = vmatprep.subr.bf16.mxu1 %v3537_v24 }
 0x23f   :  { %1465 = vmatpush1.bf16.msra.mxu0 %v3544_v25  ;;  %1506 = vmatpush1.bf16.msra.mxu1 %v3551_v26 }
 0x240   :  { %1466 = vmatprep.subr.bf16.mxu0 %v3558_v27  ;;  %1507 = vmatprep.subr.bf16.mxu1 %v3563_v28 }
 0x243   :  { %1467 = vmatpush1.bf16.msra.mxu0 %v3573_v30  ;;  %1508 = vmatpush1.bf16.msra.mxu1 %v3578_v31 }
 0x244   :  { %1468 = vmatprep.subr.bf16.mxu0 %v3585_v32  ;;  %1509 = vmatprep.subr.bf16.mxu1 %v3592_v33 }
 0x247   :  { %1469 = vmatpush1.bf16.msra.mxu0 %v3599_v34  ;;  %1510 = vmatpush1.bf16.msra.mxu1 %v3604_v35 }
 0x248   :  { %1470 = vmatprep.subr.bf16.mxu0 %v3611_v36  ;;  %1511 = vmatprep.subr.bf16.mxu1 %v3618_v37 }
 0x24b   :  { %1471 = vmatpush1.bf16.msra.mxu0 %v3628_v39  ;;  %1512 = vmatpush1.bf16.msra.mxu1 %v3633_v40 }
 0x24c   :  { %1472 = vmatprep.subr.bf16.mxu0 %v3638_v41  ;;  %1513 = vmatprep.subr.bf16.mxu1 %v3643_v42 }
 0x24f   :  { %1473 = vmatpush1.bf16.msra.mxu0 %v3652_v43  ;;  %1514 = vmatpush1.bf16.msra.mxu1 %v3657_v44 }
 0x250   :  { %1815 = vmatprep.subr.bf16.mxu1 %v3894_v46 }
 0x305   :  { %v1176_v10 = vpop.f32.mrb[24].mxu0  ;;  %v1217_v12 = vpop.f32.mrb[24].mxu1 }
 0x306   :  { %v1224_v14 = vadd.f32 %v1176_v10, %v3726_v8  ;;  %v1226_v15 = vadd.f32 %v1217_v12, %v3729_v19  ;;  %v1178_v16 = vpop.f32.mrb[25].mxu0  ;;  %v1219_v17 = vpop.f32.mrb[25].mxu1  ;;  %v4072_v10 = vld [vmem:[%s4230_s2 + $0xe8] ss:$16 sps:$4 sm:$0xff]  }
 0x307   :  { %v1225_v18 = vadd.f32 %v1178_v16, %v3731_v38  ;;  %v1227_v21 = vadd.f32 %v1219_v17, %v4257_v20  ;;  %v1180_v22 = vpop.f32.mrb[26].mxu0  ;;  %v1221_v23 = vpop.f32.mrb[26].mxu1  ;;  %v3889_v38 = vld [vmem:[%s4230_s2 + $0x4] ss:$16 sps:$4 sm:$0xff]  }
 0x308   :  { %v2970_v24 = vmul.f32 -1.442695, %v1224_v14  ;;  %v1181_v25 = vpop.f32.mrb[27].mxu0  ;;  %v1222_v26 = vpop.f32.mrb[27].mxu1  ;;  %1774 = vmatprep.subr.bf16.mxu0 %v3889_v38  ;;  %v4259_v17 = vld [vmem:[#allocation7_spill] sm:$0xff]  ;;  %v4260_v22 = vld [vmem:[#allocation8_spill] sm:$0xff] }
 0x309   :  { %v2971_v27 = vmul.f32 -1.442695, %v1225_v18  ;;  %v2972_v28 = vmul.f32 -1.442695, %v1227_v21 }
 0x30a   :  { %3300 = vpow2.f32 %v2970_v24  ;;  %v4261_v24 = vld [vmem:[#allocation9_spill] sm:$0xff] }
 0x30b   :  { %3302 = vpow2.f32 %v2971_v27 }
 0x30c   :  { %3304 = vpow2.f32 %v2972_v28 }
 0x30d   :  { %3306 = vtanh.f32 %v1226_v15  ;;  %v4258_v15 = vld [vmem:[#allocation6_spill] sm:$0xff] }
 0x314   :  { %v3301_v30 = vpop.eup %3300 }
 0x315   :  { %v3303_v31 = vpop.eup %3302  ;;  %v1231_v32 = vadd.f32 1.0, %v3301_v30 }
 0x316   :  { %v1237_v33 = vadd.f32 1.0, %v3303_v31  ;;  %v3305_v34 = vpop.eup %3304 }
 0x317   :  { %3308 = vrcp.f32 %v1231_v32  ;;  %v3307_v35 = vpop.eup %3306  ;;  %v1244_v40 = vadd.f32 1.0, %v3305_v34 }
 0x318   :  { %3310 = vrcp.f32 %v1237_v33 }
 0x319   :  { %3312 = vrcp.f32 %v1244_v40 }
 0x321   :  { %v3309_v36 = vpop.eup %3308 }
 0x322   :  { %v3311_v37 = vpop.eup %3310  ;;  %v1248_v39 = vmul.f32 %v3309_v36, %v3307_v35 }
 0x323   :  { %v1247_v41 = vmul.f32 %v3311_v37, %v3835_v9  ;;  %v3313_v43 = vpop.eup %3312  ;;  %v4043_v9 = vld [vmem:[%s4230_s2 + $0xc0] ss:$16 sps:$4 sm:$0xff]  }
 0x325   :  { %v3878_v42 = vadd.f32 %v1248_v39, %v1247_v41 }
 0x327   :  { %3314 = vtanh.f32 %v3878_v42 }
 0x331   :  { %v3315_v44 = vpop.eup %3314 }
 0x332   :  { %v1251_v8 = vmul.f32 %v3315_v44, %v3313_v43 }
 0x334   :  { %2973 = vst [vmem:[%s4232_s4 + $0x10] sm:$0xff] %v1251_v8  ;;  %v1265_v19 = vpack.c.bf16 %v1251_v8, %v1251_v8 }
 0x336   :  { %1491 = vmatmul.mubr.bf16.vlgmr.msra.gmra.mrb[28].mxu0 %v1265_v19  ;;  %1532 = vmatmul.mubr.bf16.vlgmr.msra.gmra.mrb[28].mxu1 %v1265_v19 }
 0x337   :  { %1806 = vmatprep.mubr.bf16.mxu0 %v4256_v6  ;;  %1847 = vmatprep.mubr.bf16.mxu1 %v4256_v6 }
 0x338   :  { %1775 = vmatpush1.bf16.msra.mxu0 %v3899_v47  ;;  %1816 = vmatpush1.bf16.msra.mxu1 %v3904_v51 }
 0x339   :  { %1776 = vmatprep.subr.bf16.mxu0 %v3913_v62  ;;  %1817 = vmatprep.subr.bf16.mxu1 %v3918_v7 }
 0x33c   :  { %1777 = vmatpush1.bf16.msra.mxu0 %v3923_v54  ;;  %1818 = vmatpush1.bf16.msra.mxu1 %v3928_v53 }
 0x33d   :  { %1778 = vmatprep.subr.bf16.mxu0 %v3937_v55  ;;  %1819 = vmatprep.subr.bf16.mxu1 %v3942_v57 }
 0x340   :  { %1779 = vmatpush1.bf16.msra.mxu0 %v3947_v56  ;;  %1820 = vmatpush1.bf16.msra.mxu1 %v3952_v58 }
 0x341   :  { %1780 = vmatprep.subr.bf16.mxu0 %v3961_v1  ;;  %1821 = vmatprep.subr.bf16.mxu1 %v3966_v11 }
 0x344   :  { %1781 = vmatpush1.bf16.msra.mxu0 %v3971_v13  ;;  %1822 = vmatpush1.bf16.msra.mxu1 %v3976_v59 }
 0x345   :  { %1782 = vmatprep.subr.bf16.mxu0 %v3985_v60  ;;  %1823 = vmatprep.subr.bf16.mxu1 %v3990_v63 }
 0x348   :  { %1783 = vmatpush1.bf16.msra.mxu0 %v3995_v2  ;;  %1824 = vmatpush1.bf16.msra.mxu1 %v4000_v4 }
 0x349   :  { %1784 = vmatprep.subr.bf16.mxu0 %v4007_v3  ;;  %1825 = vmatprep.subr.bf16.mxu1 %v4024_v29 }
 0x34c   :  { %1785 = vmatpush1.bf16.msra.mxu0 %v4014_v5  ;;  %1826 = vmatpush1.bf16.msra.mxu1 %v4019_v48 }
 0x34d   :  { %1786 = vmatprep.subr.bf16.mxu0 %v4030_v0  ;;  %1827 = vmatprep.subr.bf16.mxu1 %v4035_v50 }
 0x350   :  { %1787 = vmatpush1.bf16.msra.mxu0 %v4043_v9  ;;  %1828 = vmatpush1.bf16.msra.mxu1 %v4048_v49 }
 0x351   :  { %1788 = vmatprep.subr.bf16.mxu0 %v4055_v61  ;;  %1829 = vmatprep.subr.bf16.mxu1 %v4060_v52 }
 0x354   :  { %1789 = vmatpush1.bf16.msra.mxu0 %v4067_v45  ;;  %1830 = vmatpush1.bf16.msra.mxu1 %v4072_v10 }
 0x355   :  { %2090 = vmatprep.subr.bf16.mxu0 %v3889_v38  ;;  %2131 = vmatprep.subr.bf16.mxu1 %v3894_v46 }
 0x409   :  { %v1492_v12 = vpop.f32.mrb[28].mxu0  ;;  %v1533_v14 = vpop.f32.mrb[28].mxu1 }
 0x40a   :  { %v1540_v16 = vadd.f32 %v1492_v12, %v4258_v15  ;;  %v1542_v18 = vadd.f32 %v1533_v14, %v4259_v17  ;;  %v1494_v20 = vpop.f32.mrb[29].mxu0  ;;  %v1535_v21 = vpop.f32.mrb[29].mxu1 }
 0x40b   :  { %v1541_v23 = vadd.f32 %v1494_v20, %v4260_v22  ;;  %v1543_v25 = vadd.f32 %v1535_v21, %v4261_v24  ;;  %v1496_v26 = vpop.f32.mrb[30].mxu0  ;;  %v1537_v27 = vpop.f32.mrb[30].mxu1  ;;  %v4262_v20 = vld [vmem:[#allocation10_spill] sm:$0xff]  ;;  %v4263_v22 = vld [vmem:[#allocation11_spill] sm:$0xff] }
 0x40c   :  { %v3006_v28 = vmul.f32 -1.442695, %v1540_v16  ;;  %v1497_v30 = vpop.f32.mrb[31].mxu0  ;;  %v1538_v31 = vpop.f32.mrb[31].mxu1  ;;  %v4264_v26 = vld [vmem:[#allocation12_spill] sm:$0xff] }
 0x40d   :  { %v3007_v32 = vmul.f32 -1.442695, %v1541_v23  ;;  %v3008_v33 = vmul.f32 -1.442695, %v1543_v25 }
 0x40e   :  { %3316 = vpow2.f32 %v3006_v28  ;;  %v4265_v28 = vld [vmem:[#allocation13_spill] sm:$0xff] }
 0x40f   :  { %3318 = vpow2.f32 %v3007_v32 }
 0x410   :  { %3320 = vpow2.f32 %v3008_v33 }
 0x411   :  { %3322 = vtanh.f32 %v1542_v18 }
 0x418   :  { %v3317_v34 = vpop.eup %3316 }
 0x419   :  { %v3319_v35 = vpop.eup %3318  ;;  %v1547_v36 = vadd.f32 1.0, %v3317_v34 }
 0x41a   :  { %v1553_v37 = vadd.f32 1.0, %v3319_v35  ;;  %v3321_v39 = vpop.eup %3320 }
 0x41b   :  { %3324 = vrcp.f32 %v1547_v36  ;;  %v3323_v40 = vpop.eup %3322  ;;  %v1560_v8 = vadd.f32 1.0, %v3321_v39 }
 0x41c   :  { %3326 = vrcp.f32 %v1553_v37 }
 0x41d   :  { %3328 = vrcp.f32 %v1560_v8 }
 0x425   :  { %v3325_v41 = vpop.eup %3324 }
 0x426   :  { %v3327_v43 = vpop.eup %3326  ;;  %v1564_v44 = vmul.f32 %v3325_v41, %v3323_v40 }
 0x427   :  { %v1563_v19 = vmul.f32 %v3327_v43, %v3878_v42  ;;  %v3329_v14 = vpop.eup %3328 }
 0x429   :  { %v4085_v12 = vadd.f32 %v1564_v44, %v1563_v19 }
 0x42b   :  { %3330 = vtanh.f32 %v4085_v12 }
 0x435   :  { %v3331_v15 = vpop.eup %3330 }
 0x436   :  { %v1567_v16 = vmul.f32 %v3331_v15, %v3329_v14 }
 0x438   :  { %3009 = vst [vmem:[%s4232_s4 + $0x18] sm:$0xff] %v1567_v16  ;;  %v1581_v17 = vpack.c.bf16 %v1567_v16, %v1567_v16 }
 0x43a   :  { %1807 = vmatmul.mubr.bf16.vlgmr.msra.gmra.mrb[32].mxu0 %v1581_v17  ;;  %1848 = vmatmul.mubr.bf16.vlgmr.msra.gmra.mrb[32].mxu1 %v1581_v17 }
 0x43b   :  { %2091 = vmatpush1.bf16.msra.mxu0 %v3899_v47  ;;  %2132 = vmatpush1.bf16.msra.mxu1 %v3904_v51 }
 0x43c   :  { %2092 = vmatprep.subr.bf16.mxu0 %v3913_v62  ;;  %2133 = vmatprep.subr.bf16.mxu1 %v3918_v7 }
 0x43d   :  { %2122 = vmatprep.mubr.bf16.mxu0 %v4256_v6  ;;  %2163 = vmatprep.mubr.bf16.mxu1 %v4256_v6 }
 0x43f   :  { %2093 = vmatpush1.bf16.msra.mxu0 %v3923_v54  ;;  %2134 = vmatpush1.bf16.msra.mxu1 %v3928_v53 }
 0x440   :  { %2094 = vmatprep.subr.bf16.mxu0 %v3937_v55  ;;  %2135 = vmatprep.subr.bf16.mxu1 %v3942_v57 }
 0x443   :  { %2095 = vmatpush1.bf16.msra.mxu0 %v3947_v56  ;;  %2136 = vmatpush1.bf16.msra.mxu1 %v3952_v58 }
 0x444   :  { %2096 = vmatprep.subr.bf16.mxu0 %v3961_v1  ;;  %2137 = vmatprep.subr.bf16.mxu1 %v3966_v11 }
 0x447   :  { %2097 = vmatpush1.bf16.msra.mxu0 %v3971_v13  ;;  %2138 = vmatpush1.bf16.msra.mxu1 %v3976_v59 }
 0x448   :  { %2098 = vmatprep.subr.bf16.mxu0 %v3985_v60  ;;  %2139 = vmatprep.subr.bf16.mxu1 %v3990_v63 }
 0x44b   :  { %2099 = vmatpush1.bf16.msra.mxu0 %v3995_v2  ;;  %2140 = vmatpush1.bf16.msra.mxu1 %v4000_v4 }
 0x44c   :  { %2100 = vmatprep.subr.bf16.mxu0 %v4007_v3  ;;  %2141 = vmatprep.subr.bf16.mxu1 %v4024_v29 }
 0x44f   :  { %2101 = vmatpush1.bf16.msra.mxu0 %v4014_v5  ;;  %2142 = vmatpush1.bf16.msra.mxu1 %v4019_v48 }
 0x450   :  { %2102 = vmatprep.subr.bf16.mxu0 %v4030_v0  ;;  %2143 = vmatprep.subr.bf16.mxu1 %v4035_v50 }
 0x453   :  { %2103 = vmatpush1.bf16.msra.mxu0 %v4043_v9  ;;  %2144 = vmatpush1.bf16.msra.mxu1 %v4048_v49 }
 0x454   :  { %2104 = vmatprep.subr.bf16.mxu0 %v4055_v61  ;;  %2145 = vmatprep.subr.bf16.mxu1 %v4060_v52 }
 0x457   :  { %2105 = vmatpush1.bf16.msra.mxu0 %v4067_v45  ;;  %2146 = vmatpush1.bf16.msra.mxu1 %v4072_v10 }
 0x458   :  { %2406 = vmatprep.subr.bf16.mxu0 %v3889_v38  ;;  %2447 = vmatprep.subr.bf16.mxu1 %v3894_v46 }
 0x50d   :  { %v1808_v42 = vpop.f32.mrb[32].mxu0  ;;  %v1849_v18 = vpop.f32.mrb[32].mxu1 }
 0x50e   :  { %v1856_v21 = vadd.f32 %v1808_v42, %v4262_v20  ;;  %v1858_v23 = vadd.f32 %v1849_v18, %v4263_v22  ;;  %v1810_v24 = vpop.f32.mrb[33].mxu0  ;;  %v1851_v25 = vpop.f32.mrb[33].mxu1 }
 0x50f   :  { %v1857_v27 = vadd.f32 %v1810_v24, %v4264_v26  ;;  %v1859_v30 = vadd.f32 %v1851_v25, %v4265_v28  ;;  %v1812_v31 = vpop.f32.mrb[34].mxu0  ;;  %v1853_v32 = vpop.f32.mrb[34].mxu1  ;;  %v4266_v24 = vld [vmem:[#allocation14_spill] sm:$0xff]  ;;  %v4267_v26 = vld [vmem:[#allocation15_spill] sm:$0xff] }
 0x510   :  { %v3042_v33 = vmul.f32 -1.442695, %v1856_v21  ;;  %v1813_v34 = vpop.f32.mrb[35].mxu0  ;;  %v1854_v35 = vpop.f32.mrb[35].mxu1  ;;  %v4268_v31 = vld [vmem:[#allocation16_spill] sm:$0xff] }
 0x511   :  { %v3043_v36 = vmul.f32 -1.442695, %v1857_v27  ;;  %v3044_v37 = vmul.f32 -1.442695, %v1859_v30 }
 0x512   :  { %3332 = vpow2.f32 %v3042_v33  ;;  %v4269_v33 = vld [vmem:[#allocation17_spill] sm:$0xff] }
 0x513   :  { %3334 = vpow2.f32 %v3043_v36 }
 0x514   :  { %3336 = vpow2.f32 %v3044_v37 }
 0x515   :  { %3338 = vtanh.f32 %v1858_v23 }
 0x51c   :  { %v3333_v39 = vpop.eup %3332 }
 0x51d   :  { %v3335_v40 = vpop.eup %3334  ;;  %v1863_v41 = vadd.f32 1.0, %v3333_v39 }
 0x51e   :  { %v1869_v43 = vadd.f32 1.0, %v3335_v40  ;;  %v3337_v44 = vpop.eup %3336 }
 0x51f   :  { %3340 = vrcp.f32 %v1863_v41  ;;  %v3339_v8 = vpop.eup %3338  ;;  %v1876_v16 = vadd.f32 1.0, %v3337_v44 }
 0x520   :  { %3342 = vrcp.f32 %v1869_v43 }
 0x521   :  { %3344 = vrcp.f32 %v1876_v16 }
 0x529   :  { %v3341_v19 = vpop.eup %3340 }
 0x52a   :  { %v3343_v14 = vpop.eup %3342  ;;  %v1880_v15 = vmul.f32 %v3341_v19, %v3339_v8 }
 0x52b   :  { %v1879_v17 = vmul.f32 %v3343_v14, %v4085_v12  ;;  %v3345_v18 = vpop.eup %3344 }
 0x52d   :  { %v4130_v42 = vadd.f32 %v1880_v15, %v1879_v17 }
 0x52f   :  { %3346 = vtanh.f32 %v4130_v42 }
 0x539   :  { %v3347_v20 = vpop.eup %3346 }
 0x53a   :  { %v1883_v21 = vmul.f32 %v3347_v20, %v3345_v18 }
 0x53c   :  { %3045 = vst [vmem:[%s4232_s4 + $0x20] sm:$0xff] %v1883_v21  ;;  %v1897_v22 = vpack.c.bf16 %v1883_v21, %v1883_v21 }
 0x53e   :  { %2123 = vmatmul.mubr.bf16.vlgmr.msra.gmra.mrb[36].mxu0 %v1897_v22  ;;  %2164 = vmatmul.mubr.bf16.vlgmr.msra.gmra.mrb[36].mxu1 %v1897_v22 }
 0x53f   :  { %2407 = vmatpush1.bf16.msra.mxu0 %v3899_v47  ;;  %2448 = vmatpush1.bf16.msra.mxu1 %v3904_v51 }
 0x540   :  { %2408 = vmatprep.subr.bf16.mxu0 %v3913_v62  ;;  %2449 = vmatprep.subr.bf16.mxu1 %v3918_v7 }
 0x541   :  { %2438 = vmatprep.mubr.bf16.mxu0 %v4256_v6  ;;  %2479 = vmatprep.mubr.bf16.mxu1 %v4256_v6 }
 0x543   :  { %2409 = vmatpush1.bf16.msra.mxu0 %v3923_v54  ;;  %2450 = vmatpush1.bf16.msra.mxu1 %v3928_v53 }
 0x544   :  { %2410 = vmatprep.subr.bf16.mxu0 %v3937_v55  ;;  %2451 = vmatprep.subr.bf16.mxu1 %v3942_v57 }
 0x547   :  { %2411 = vmatpush1.bf16.msra.mxu0 %v3947_v56  ;;  %2452 = vmatpush1.bf16.msra.mxu1 %v3952_v58 }
 0x548   :  { %2412 = vmatprep.subr.bf16.mxu0 %v3961_v1  ;;  %2453 = vmatprep.subr.bf16.mxu1 %v3966_v11 }
 0x54b   :  { %2413 = vmatpush1.bf16.msra.mxu0 %v3971_v13  ;;  %2454 = vmatpush1.bf16.msra.mxu1 %v3976_v59 }
 0x54c   :  { %2414 = vmatprep.subr.bf16.mxu0 %v3985_v60  ;;  %2455 = vmatprep.subr.bf16.mxu1 %v3990_v63 }
 0x54f   :  { %2415 = vmatpush1.bf16.msra.mxu0 %v3995_v2  ;;  %2456 = vmatpush1.bf16.msra.mxu1 %v4000_v4 }
 0x550   :  { %2416 = vmatprep.subr.bf16.mxu0 %v4007_v3  ;;  %2457 = vmatprep.subr.bf16.mxu1 %v4024_v29 }
 0x553   :  { %2417 = vmatpush1.bf16.msra.mxu0 %v4014_v5  ;;  %2458 = vmatpush1.bf16.msra.mxu1 %v4019_v48 }
 0x554   :  { %2418 = vmatprep.subr.bf16.mxu0 %v4030_v0  ;;  %2459 = vmatprep.subr.bf16.mxu1 %v4035_v50 }
 0x557   :  { %2419 = vmatpush1.bf16.msra.mxu0 %v4043_v9  ;;  %2460 = vmatpush1.bf16.msra.mxu1 %v4048_v49 }
 0x558   :  { %2420 = vmatprep.subr.bf16.mxu0 %v4055_v61  ;;  %2461 = vmatprep.subr.bf16.mxu1 %v4060_v52 }
 0x55b   :  { %2421 = vmatpush1.bf16.msra.mxu0 %v4067_v45  ;;  %2462 = vmatpush1.bf16.msra.mxu1 %v4072_v10 }
 0x55c   :  { %2722 = vmatprep.subr.bf16.mxu0 %v3889_v38  ;;  %2763 = vmatprep.subr.bf16.mxu1 %v3894_v46 }
 0x611   :  { %v2124_v12 = vpop.f32.mrb[36].mxu0  ;;  %v2165_v23 = vpop.f32.mrb[36].mxu1 }
 0x612   :  { %v2172_v25 = vadd.f32 %v2124_v12, %v4266_v24  ;;  %v2174_v27 = vadd.f32 %v2165_v23, %v4267_v26  ;;  %v2126_v28 = vpop.f32.mrb[37].mxu0  ;;  %v2167_v30 = vpop.f32.mrb[37].mxu1 }
 0x613   :  { %v2173_v32 = vadd.f32 %v2126_v28, %v4268_v31  ;;  %v2175_v34 = vadd.f32 %v2167_v30, %v4269_v33  ;;  %v2128_v35 = vpop.f32.mrb[38].mxu0  ;;  %v2169_v36 = vpop.f32.mrb[38].mxu1  ;;  %v4274_v31 = vld [vmem:[#allocation22_spill] sm:$0xff]  ;;  %v4275_v33 = vld [vmem:[#allocation23_spill] sm:$0xff] }
 0x614   :  { %v3078_v37 = vmul.f32 -1.442695, %v2172_v25  ;;  %v2129_v39 = vpop.f32.mrb[39].mxu0  ;;  %v2170_v40 = vpop.f32.mrb[39].mxu1 }
 0x615   :  { %v3079_v38 = vmul.f32 -1.442695, %v2173_v32  ;;  %v3080_v46 = vmul.f32 -1.442695, %v2175_v34  ;;  %v4277_v40 = vld [vmem:[#allocation25_spill] sm:$0xff] }
 0x616   :  { %3348 = vpow2.f32 %v3078_v37  ;;  %v4276_v37 = vld [vmem:[#allocation24_spill] sm:$0xff] }
 0x617   :  { %3350 = vpow2.f32 %v3079_v38 }
 0x618   :  { %3352 = vpow2.f32 %v3080_v46 }
 0x619   :  { %3354 = vtanh.f32 %v2174_v27 }
 0x620   :  { %v3349_v41 = vpop.eup %3348 }
 0x621   :  { %v3351_v43 = vpop.eup %3350  ;;  %v2179_v44 = vadd.f32 1.0, %v3349_v41 }
 0x622   :  { %v2185_v8 = vadd.f32 1.0, %v3351_v43  ;;  %v3353_v19 = vpop.eup %3352 }
 0x623   :  { %3356 = vrcp.f32 %v2179_v44  ;;  %v3355_v14 = vpop.eup %3354  ;;  %v2192_v18 = vadd.f32 1.0, %v3353_v19 }
 0x624   :  { %3358 = vrcp.f32 %v2185_v8 }
 0x625   :  { %3360 = vrcp.f32 %v2192_v18 }
 0x62d   :  { %v3357_v15 = vpop.eup %3356 }
 0x62e   :  { %v3359_v16 = vpop.eup %3358  ;;  %v2196_v17 = vmul.f32 %v3357_v15, %v3355_v14 }
 0x62f   :  { %v2195_v20 = vmul.f32 %v3359_v16, %v4130_v42  ;;  %v3361_v22 = vpop.eup %3360 }
 0x631   :  { %v4175_v21 = vadd.f32 %v2196_v17, %v2195_v20 }
 0x633   :  { %3362 = vtanh.f32 %v4175_v21 }
 0x63d   :  { %v3363_v12 = vpop.eup %3362 }
 0x63e   :  { %v2199_v23 = vmul.f32 %v3363_v12, %v3361_v22 }
 0x640   :  { %3081 = vst [vmem:[%s4232_s4 + $0x28] sm:$0xff] %v2199_v23  ;;  %v2213_v24 = vpack.c.bf16 %v2199_v23, %v2199_v23 }
 0x642   :  { %2439 = vmatmul.mubr.bf16.vlgmr.msra.gmra.mrb[40].mxu0 %v2213_v24  ;;  %2480 = vmatmul.mubr.bf16.vlgmr.msra.gmra.mrb[40].mxu1 %v2213_v24 }
 0x643   :  { %2723 = vmatpush1.bf16.msra.mxu0 %v3899_v47  ;;  %2764 = vmatpush1.bf16.msra.mxu1 %v3904_v51  ;;  %v4270_v51 = vld [vmem:[#allocation18_spill] sm:$0xff] }
 0x644   :  { %2724 = vmatprep.subr.bf16.mxu0 %v3913_v62  ;;  %2765 = vmatprep.subr.bf16.mxu1 %v3918_v7  ;;  %v4271_v7 = vld [vmem:[#allocation19_spill] sm:$0xff] }
 0x645   :  { %2754 = vmatprep.mubr.bf16.mxu0 %v4256_v6  ;;  %2795 = vmatprep.mubr.bf16.mxu1 %v4256_v6 }
 0x647   :  { %2725 = vmatpush1.bf16.msra.mxu0 %v3923_v54  ;;  %2766 = vmatpush1.bf16.msra.mxu1 %v3928_v53 }
 0x648   :  { %2726 = vmatprep.subr.bf16.mxu0 %v3937_v55  ;;  %2767 = vmatprep.subr.bf16.mxu1 %v3942_v57  ;;  %v4272_v57 = vld [vmem:[#allocation20_spill] sm:$0xff] }
 0x64b   :  { %2727 = vmatpush1.bf16.msra.mxu0 %v3947_v56  ;;  %2768 = vmatpush1.bf16.msra.mxu1 %v3952_v58  ;;  %v4273_v58 = vld [vmem:[#allocation21_spill] sm:$0xff] }
 0x64c   :  { %2728 = vmatprep.subr.bf16.mxu0 %v3961_v1  ;;  %2769 = vmatprep.subr.bf16.mxu1 %v3966_v11 }
 0x64f   :  { %2729 = vmatpush1.bf16.msra.mxu0 %v3971_v13  ;;  %2770 = vmatpush1.bf16.msra.mxu1 %v3976_v59 }
 0x650   :  { %2730 = vmatprep.subr.bf16.mxu0 %v3985_v60  ;;  %2771 = vmatprep.subr.bf16.mxu1 %v3990_v63 }
 0x653   :  { %2731 = vmatpush1.bf16.msra.mxu0 %v3995_v2  ;;  %2772 = vmatpush1.bf16.msra.mxu1 %v4000_v4 }
 0x654   :  { %2732 = vmatprep.subr.bf16.mxu0 %v4007_v3  ;;  %2773 = vmatprep.subr.bf16.mxu1 %v4024_v29 }
 0x657   :  { %2733 = vmatpush1.bf16.msra.mxu0 %v4014_v5  ;;  %2774 = vmatpush1.bf16.msra.mxu1 %v4019_v48 }
 0x658   :  { %2734 = vmatprep.subr.bf16.mxu0 %v4030_v0  ;;  %2775 = vmatprep.subr.bf16.mxu1 %v4035_v50 }
 0x65b   :  { %2735 = vmatpush1.bf16.msra.mxu0 %v4043_v9  ;;  %2776 = vmatpush1.bf16.msra.mxu1 %v4048_v49 }
 0x65c   :  { %2736 = vmatprep.subr.bf16.mxu0 %v4055_v61  ;;  %2777 = vmatprep.subr.bf16.mxu1 %v4060_v52 }
 0x65f   :  { %2737 = vmatpush1.bf16.msra.mxu0 %v4067_v45  ;;  %2778 = vmatpush1.bf16.msra.mxu1 %v4072_v10 }
 0x715   :  { %v2440_v6 = vpop.f32.mrb[40].mxu0  ;;  %v2481_v47 = vpop.f32.mrb[40].mxu1 }
 0x716   :  { %v2488_v62 = vadd.f32 %v2440_v6, %v4270_v51  ;;  %v2490_v54 = vadd.f32 %v2481_v47, %v4271_v7  ;;  %v2442_v53 = vpop.f32.mrb[41].mxu0  ;;  %v2483_v55 = vpop.f32.mrb[41].mxu1 }
 0x717   :  { %v2489_v56 = vadd.f32 %v2442_v53, %v4272_v57  ;;  %v2491_v1 = vadd.f32 %v2483_v55, %v4273_v58  ;;  %v2444_v11 = vpop.f32.mrb[42].mxu0  ;;  %v2485_v13 = vpop.f32.mrb[42].mxu1 }
 0x718   :  { %v3114_v59 = vmul.f32 -1.442695, %v2488_v62  ;;  %v2445_v60 = vpop.f32.mrb[43].mxu0  ;;  %v2486_v63 = vpop.f32.mrb[43].mxu1 }
 0x719   :  { %v3115_v2 = vmul.f32 -1.442695, %v2489_v56  ;;  %v3116_v4 = vmul.f32 -1.442695, %v2491_v1 }
 0x71a   :  { %3364 = vpow2.f32 %v3114_v59 }
 0x71b   :  { %3366 = vpow2.f32 %v3115_v2 }
 0x71c   :  { %3368 = vpow2.f32 %v3116_v4 }
 0x71d   :  { %3370 = vtanh.f32 %v2490_v54 }
 0x724   :  { %v3365_v3 = vpop.eup %3364 }
 0x725   :  { %v3367_v5 = vpop.eup %3366  ;;  %v2495_v48 = vadd.f32 1.0, %v3365_v3 }
 0x726   :  { %v2501_v29 = vadd.f32 1.0, %v3367_v5  ;;  %v3369_v0 = vpop.eup %3368 }
 0x727   :  { %3372 = vrcp.f32 %v2495_v48  ;;  %v3371_v50 = vpop.eup %3370  ;;  %v2508_v52 = vadd.f32 1.0, %v3369_v0 }
 0x728   :  { %3374 = vrcp.f32 %v2501_v29 }
 0x729   :  { %3376 = vrcp.f32 %v2508_v52 }
 0x731   :  { %v3373_v9 = vpop.eup %3372 }
 0x732   :  { %v3375_v49 = vpop.eup %3374  ;;  %v2512_v61 = vmul.f32 %v3373_v9, %v3371_v50 }
 0x733   :  { %v2511_v45 = vmul.f32 %v3375_v49, %v4175_v21  ;;  %v3377_v42 = vpop.eup %3376 }
 0x735   :  { %v2513_v10 = vadd.f32 %v2512_v61, %v2511_v45 }
 0x737   :  { %3378 = vtanh.f32 %v2513_v10 }
 0x741   :  { %v3379_v25 = vpop.eup %3378 }
 0x742   :  { %v2515_v26 = vmul.f32 %v3379_v25, %v3377_v42 }
 0x744   :  { %3117 = vst [vmem:[%s4232_s4 + $0x30] sm:$0xff] %v2515_v26  ;;  %v2529_v27 = vpack.c.bf16 %v2515_v26, %v2515_v26 }
 0x746   :  { %2755 = vmatmul.mubr.bf16.vlgmr.msra.gmra.mrb[44].mxu0 %v2529_v27  ;;  %2796 = vmatmul.mubr.bf16.vlgmr.msra.gmra.mrb[44].mxu1 %v2529_v27 }
 0x819   :  { %v2756_v28 = vpop.f32.mrb[44].mxu0  ;;  %v2797_v30 = vpop.f32.mrb[44].mxu1 }
 0x81a   :  { %v2804_v32 = vadd.f32 %v2756_v28, %v4274_v31  ;;  %v2806_v34 = vadd.f32 %v2797_v30, %v4275_v33  ;;  %v2758_v35 = vpop.f32.mrb[45].mxu0  ;;  %v2799_v36 = vpop.f32.mrb[45].mxu1 }
 0x81b   :  { %v2805_v39 = vadd.f32 %v2758_v35, %v4276_v37  ;;  %v2807_v38 = vadd.f32 %v2799_v36, %v4277_v40  ;;  %v2760_v46 = vpop.f32.mrb[46].mxu0  ;;  %v2801_v41 = vpop.f32.mrb[46].mxu1 }
 0x81c   :  { %v3150_v43 = vmul.f32 -1.442695, %v2804_v32  ;;  %v2761_v44 = vpop.f32.mrb[47].mxu0  ;;  %v2802_v8 = vpop.f32.mrb[47].mxu1 }
 0x81d   :  { %v3151_v19 = vmul.f32 -1.442695, %v2805_v39  ;;  %v3152_v14 = vmul.f32 -1.442695, %v2807_v38 }
 0x81e   :  { %3380 = vpow2.f32 %v3150_v43 }
 0x81f   :  { %3382 = vpow2.f32 %v3151_v19 }
 0x820   :  { %3384 = vpow2.f32 %v3152_v14 }
 0x821   :  { %3386 = vtanh.f32 %v2806_v34 }
 0x828   :  { %v3381_v15 = vpop.eup %3380 }
 0x829   :  { %v3383_v16 = vpop.eup %3382  ;;  %v2811_v17 = vadd.f32 1.0, %v3381_v15 }
 0x82a   :  { %v2817_v18 = vadd.f32 1.0, %v3383_v16  ;;  %v3385_v20 = vpop.eup %3384 }
 0x82b   :  { %3388 = vrcp.f32 %v2811_v17  ;;  %v3387_v21 = vpop.eup %3386  ;;  %v2824_v24 = vadd.f32 1.0, %v3385_v20 }
 0x82c   :  { %3390 = vrcp.f32 %v2817_v18 }
 0x82d   :  { %3392 = vrcp.f32 %v2824_v24 }
 0x835   :  { %v3389_v22 = vpop.eup %3388 }
 0x836   :  { %v3391_v12 = vpop.eup %3390  ;;  %v2828_v23 = vmul.f32 %v3389_v22, %v3387_v21 }
 0x837   :  { %v2827_v6 = vmul.f32 %v3391_v12, %v2513_v10  ;;  %v3393_v51 = vpop.eup %3392 }
 0x839   :  { %v2829_v47 = vadd.f32 %v2828_v23, %v2827_v6 }
 0x83b   :  { %3394 = vtanh.f32 %v2829_v47 }
 0x845   :  { %v3395_v62 = vpop.eup %3394 }
 0x846   :  { %v2831_v7 = vmul.f32 %v3395_v62, %v3393_v51 }
 0x848   :  { %3153 = vst [vmem:[%s4232_s4 + $0x38] sm:$0xff] %v2831_v7 }

</bundles_post_ra>
